<compile_context>
chip_gen: v6e
topology: v6e:2x2x1
jax: 0.10.0
libtpu: 0.0.40
codegen_flags: <defaults>
</compile_context>

<pallas_src>
import functools

import jax
import jax.numpy as jnp
from jax import lax
from jax.experimental import pallas as pl
from jax.experimental.pallas import tpu as pltpu

JACCARD_THRESH = 0.5
NEG_POS_RATIO = 3
VARIANCES = (0.1, 0.2)


def _round_up(x, m):
    return ((x + m - 1) // m) * m


def _multibox_loss_kernel(targets_ref, dbox_ref, loc_ref, conf_ref, out_ref,
                          lc_col_scr, *, num_obj, num_dbox, num_classes,
                          rank_tile, num_rank_tiles, unroll_rank_loop):
    M, D, C = num_obj, num_dbox, num_classes
    dj, num_j = rank_tile, num_rank_tiles
    Dp = dj * num_j

    # ------------------- match: jaccard overlap + assignment ---------------
    cx = dbox_ref[0:1, :]                       # (1, D)
    cy = dbox_ref[1:2, :]
    w = dbox_ref[2:3, :]
    h = dbox_ref[3:4, :]
    d_xmin = cx - 0.5 * w
    d_ymin = cy - 0.5 * h
    d_xmax = cx + 0.5 * w
    d_ymax = cy + 0.5 * h

    t = targets_ref[...]                        # (M, 5) = [xmin, ymin, xmax, ymax, label]
    t_xmin = t[:, 0:1]
    t_ymin = t[:, 1:2]
    t_xmax = t[:, 2:3]
    t_ymax = t[:, 3:4]

    ix0 = jnp.maximum(t_xmin, d_xmin)
    iy0 = jnp.maximum(t_ymin, d_ymin)
    ix1 = jnp.minimum(t_xmax, d_xmax)
    iy1 = jnp.minimum(t_ymax, d_ymax)
    inter = jnp.maximum(ix1 - ix0, 0.0) * jnp.maximum(iy1 - iy0, 0.0)
    area_t = (t_xmax - t_xmin) * (t_ymax - t_ymin)       # (M, 1)
    area_d = (d_xmax - d_xmin) * (d_ymax - d_ymin)       # (1, D)
    overlaps = inter / (area_t + area_d - inter)         # (M, D)

    iota_d = lax.broadcasted_iota(jnp.int32, (M, D), 1)
    iota_m = lax.broadcasted_iota(jnp.int32, (M, D), 0)

    # best default box per ground truth (argmax over lanes)
    best_prior_overlap = jnp.max(overlaps, axis=1, keepdims=True)            # (M, 1)
    best_prior_idx = jnp.min(
        jnp.where(overlaps == best_prior_overlap, iota_d, D), axis=1, keepdims=True)

    # best ground truth per default box (argmax over sublanes)
    best_truth_overlap = jnp.max(overlaps, axis=0, keepdims=True)            # (1, D)
    best_truth_idx = jnp.min(
        jnp.where(overlaps == best_truth_overlap, iota_m, M), axis=0, keepdims=True)

    # force-match (vectorised over M): each truth's best prior becomes a
    # positive match; on conflicts the LAST truth wins (like the PyTorch loop).
    hit_md = iota_d == best_prior_idx                                        # (M, D)
    hit_any = jnp.max(hit_md.astype(jnp.float32), axis=0, keepdims=True) > 0.5
    forced_idx = jnp.max(jnp.where(hit_md, iota_m, -1), axis=0, keepdims=True)
    best_truth_overlap = jnp.where(hit_any, 2.0, best_truth_overlap)
    best_truth_idx = jnp.where(hit_any, forced_idx, best_truth_idx)          # (1, D)

    # gather matched ground-truth boxes / labels via an exact one-hot
    # weighted sum, column-by-column (keeps temporaries at (M, D)).
    onehot = (iota_m == best_truth_idx).astype(jnp.float32)                  # (M, D)

    def gather(col):
        return jnp.sum(onehot * t[:, col:col + 1], axis=0, keepdims=True)    # (1, D)

    m_xmin = gather(0)
    m_ymin = gather(1)
    m_xmax = gather(2)
    m_ymax = gather(3)
    m_lab = gather(4)

    conf_lab = m_lab + 1.0
    conf_lab = jnp.where(best_truth_overlap < JACCARD_THRESH, 0.0, conf_lab)  # (1, D)
    pos = conf_lab > 0.5                                                      # (1, D)
    npos = jnp.sum(pos.astype(jnp.float32))

    # encode offsets with SSD variances, lane-dense (4, D)
    g_cx = ((m_xmin + m_xmax) * 0.5 - cx) / (VARIANCES[0] * w)
    g_cy = ((m_ymin + m_ymax) * 0.5 - cy) / (VARIANCES[0] * h)
    g_w = jnp.log((m_xmax - m_xmin) / w) / VARIANCES[1]
    g_h = jnp.log((m_ymax - m_ymin) / h) / VARIANCES[1]
    loc_t = jnp.concatenate([g_cx, g_cy, g_w, g_h], axis=0)                   # (4, D)

    # ------------------- smooth L1 over positive boxes ----------------------
    diff = loc_ref[...] - loc_t                                               # (4, D)
    ad = jnp.abs(diff)
    sl1 = jnp.where(ad < 1.0, 0.5 * diff * diff, ad - 0.5)
    loss_l = jnp.sum(jnp.where(pos, sl1, 0.0))

    # ------------------- per-box cross entropy (classes in sublanes) --------
    conf = conf_ref[...]                                                      # (C, D)
    mx = jnp.max(conf, axis=0, keepdims=True)
    lse = jnp.log(jnp.sum(jnp.exp(conf - mx), axis=0, keepdims=True)) + mx    # (1, D)
    cls_iota = lax.broadcasted_iota(jnp.int32, (C, D), 0)
    labels_i = conf_lab.astype(jnp.int32)
    conf_at = jnp.sum(jnp.where(cls_iota == labels_i, conf, 0.0),
                      axis=0, keepdims=True)
    ce = lse - conf_at                                                        # (1, D)

    # ------------------- hard negative mining -------------------------------
    # rank[i] = #{ j : lc[j] > lc[i]  or (lc[j] == lc[i] and j < i) }
    # (exactly a stable descending sort rank).  Computed over j-tiles of
    # width dj; the row-sum runs on the (otherwise idle) MXU.
    lc = jnp.where(pos, 0.0, ce)                                              # (1, D)
    lc_col = jnp.transpose(lc, (1, 0))                                        # (D, 1)
    if Dp > D:                                                                # pad never matches
        lc_col = jnp.concatenate(
            [lc_col, jnp.full((Dp - D, 1), -jnp.inf, jnp.float32)], axis=0)
    lc_col_scr[...] = lc_col

    idx_row = lax.broadcasted_iota(jnp.int32, (1, D), 1)                      # i (hoisted)
    ones_row = jnp.ones((1, dj), jnp.float32)                                 # (hoisted)

    def j_body(jc, rank_acc):
        j0 = pl.multiple_of(jc * dj, dj)
        lcj = lc_col_scr[pl.ds(j0, dj), :]                                    # (dj, 1) = lc[j]
        idx_col = j0 + lax.broadcasted_iota(jnp.int32, (dj, 1), 0)            # j
        greater = jnp.logical_or(
            lcj > lc,
            jnp.logical_and(lcj == lc, idx_col < idx_row))                    # (dj, D)
        return rank_acc + jnp.dot(ones_row, greater.astype(jnp.float32),
                                  preferred_element_type=jnp.float32)

    rank = lax.fori_loop(0, num_j, j_body, jnp.zeros((1, D), jnp.float32),
                         unroll=unroll_rank_loop)                             # (1, D)

    num_neg = jnp.minimum(npos * float(NEG_POS_RATIO), float(D))
    neg = rank < num_neg
    sel = jnp.logical_or(pos, neg)
    loss_c = jnp.sum(jnp.where(sel, ce, 0.0))

    # pack the three per-image scalars into one output row (single store)
    out_ref[...] = jnp.concatenate(
        [jnp.reshape(loss_l, (1, 1)),
         jnp.reshape(loss_c, (1, 1)),
         jnp.reshape(npos, (1, 1))], axis=1)


def multibox_loss(loc_data, conf_data, dbox, targets, *, rank_tile=256):
    """Pallas MultiBoxLoss forward: returns (loss_l, loss_c).

    loc_data:  (B, D, 4) predicted offsets
    conf_data: (B, D, C) class logits
    dbox:      (D, 4)   default boxes [cx, cy, w, h]
    targets:   (B, M, 5) ground truth [xmin, ymin, xmax, ymax, label]
    """
    B, D, C = conf_data.shape
    M = targets.shape[1]

    # one-time layout change in XLA: D into lanes, coords / classes into sublanes
    dbox_t = jnp.transpose(dbox.astype(jnp.float32), (1, 0))                  # (4, D)
    loc_cd = jnp.transpose(loc_data.astype(jnp.float32), (0, 2, 1))           # (B, 4, D)
    conf_cd = jnp.transpose(conf_data.astype(jnp.float32), (0, 2, 1))         # (B, C, D)

    # rank_tile=256 keeps the per-tile (dj, D) f32 compare temp < ~9 MiB even
    # at the real SSD D=8732, well inside the scoped VMEM budget.
    dj = min(_round_up(rank_tile, 8), _round_up(D, 8))
    num_j = -(-D // dj)
    Dp = dj * num_j
    unroll_rank = num_j <= 8                                                  # LLO visibility

    kernel = functools.partial(
        _multibox_loss_kernel, num_obj=M, num_dbox=D, num_classes=C,
        rank_tile=dj, num_rank_tiles=num_j, unroll_rank_loop=unroll_rank)

    out = pl.pallas_call(
        kernel,
        grid=(B,),
        in_specs=[
            pl.BlockSpec((None, M, 5), lambda b: (b, 0, 0)),   # targets
            pl.BlockSpec((4, D), lambda b: (0, 0)),            # default boxes (resident)
            pl.BlockSpec((None, 4, D), lambda b: (b, 0, 0)),   # predicted locs
            pl.BlockSpec((None, C, D), lambda b: (b, 0, 0)),   # class logits
        ],
        out_specs=pl.BlockSpec((None, 1, 3), lambda b: (b, 0, 0)),
        out_shape=jax.ShapeDtypeStruct((B, 1, 3), jnp.float32),
        scratch_shapes=[pltpu.VMEM((Dp, 1), jnp.float32)],
        compiler_params=pltpu.CompilerParams(
            dimension_semantics=("parallel",),        # batch images are independent
            vmem_limit_bytes=32 * 1024 * 1024),
    )(targets.astype(jnp.float32), dbox_t, loc_cd, conf_cd)

    loss_l = jnp.sum(out[:, 0, 0])
    loss_c = jnp.sum(out[:, 0, 1])
    n = jnp.sum(out[:, 0, 2])
    # mirrors the reference: divides by N = num_pos.sum() (NaN if no positives)
    return loss_l / n, loss_c / n


if __name__ == "__main__":
    key = jax.random.PRNGKey(0)
    B, D, C, M = 2, 256, 21, 4          # batch, default boxes, classes, objects/image
    k1, k2, k3, k4, k5, k6 = jax.random.split(key, 6)

    # deterministic default boxes (cx, cy, w, h) in [0, 1]
    cxcy = jax.random.uniform(k1, (D, 2), minval=0.05, maxval=0.95)
    wh = jax.random.uniform(k2, (D, 2), minval=0.05, maxval=0.4)
    dbox = jnp.concatenate([cxcy, wh], axis=1).astype(jnp.float32)            # (D, 4)

    # ground-truth targets (B, M, 5) = [xmin, ymin, xmax, ymax, label]
    # TODO(synk): reference takes a variable-length target list per image; we assume fixed M.
    xy0 = jax.random.uniform(k3, (B, M, 2), minval=0.0, maxval=0.6)
    wh_t = jax.random.uniform(k4, (B, M, 2), minval=0.15, maxval=0.35)
    xy1 = jnp.minimum(xy0 + wh_t, 1.0)
    labels = jax.random.randint(k5, (B, M, 1), 0, C - 1).astype(jnp.float32)
    targets = jnp.concatenate([xy0, xy1, labels], axis=2).astype(jnp.float32)

    # SSD head outputs (deterministic synthetic "predictions")
    loc_data = 0.1 * jax.random.normal(k6, (B, D, 4), dtype=jnp.float32)
    conf_data = jax.random.normal(jax.random.PRNGKey(1), (B, D, C), dtype=jnp.float32)

    # rank_tile=128 exercises the j-tiled hard-negative-mining loop at D=256
    loss_l, loss_c = jax.jit(functools.partial(multibox_loss, rank_tile=128))(
        loc_data, conf_data, dbox, targets)
    jax.block_until_ready((loss_l, loss_c))
    print("KERNEL_OK")
</pallas_src>

<mosaic_0001>
module attributes {stable_mosaic.version = 11 : i64} {
  func.func @_multibox_loss_kernel(%arg0: i32, %arg1: memref<1x4x5xf32, #tpu.memory_space<vmem>>, %arg2: memref<4x256xf32, #tpu.memory_space<vmem>>, %arg3: memref<1x4x256xf32, #tpu.memory_space<vmem>>, %arg4: memref<1x21x256xf32, #tpu.memory_space<vmem>>, %arg5: memref<1x1x3xf32, #tpu.memory_space<vmem>>, %arg6: memref<256x1xf32, #tpu.memory_space<vmem>>) attributes {dimension_semantics = [#tpu.dimension_semantics<parallel>], iteration_bounds = array<i64: 2>, scalar_prefetch = 0 : i64, scratch_operands = 1 : i64, tpu.core_type = #tpu.core_type<tc>, window_params = [{transform_indices = @transform_0, window_bounds = array<i64: 1, 4, 5>}, {pipeline_mode = #tpu.pipeline_mode<synchronous>, transform_indices = @transform_1, window_bounds = array<i64: 4, 256>}, {transform_indices = @transform_2, window_bounds = array<i64: 1, 4, 256>}, {transform_indices = @transform_3, window_bounds = array<i64: 1, 21, 256>}, {transform_indices = @transform_4, window_bounds = array<i64: 1, 1, 3>}]} {
    %c0 = arith.constant 0 : index
    %c0_0 = arith.constant 0 : index
    %0 = vector.load %arg2[%c0, %c0_0] : memref<4x256xf32, #tpu.memory_space<vmem>>, vector<1x256xf32>
    %c1 = arith.constant 1 : index
    %c0_1 = arith.constant 0 : index
    %1 = vector.load %arg2[%c1, %c0_1] : memref<4x256xf32, #tpu.memory_space<vmem>>, vector<1x256xf32>
    %c2 = arith.constant 2 : index
    %c0_2 = arith.constant 0 : index
    %2 = vector.load %arg2[%c2, %c0_2] : memref<4x256xf32, #tpu.memory_space<vmem>>, vector<1x256xf32>
    %c3 = arith.constant 3 : index
    %c0_3 = arith.constant 0 : index
    %3 = vector.load %arg2[%c3, %c0_3] : memref<4x256xf32, #tpu.memory_space<vmem>>, vector<1x256xf32>
    %cst = arith.constant 5.000000e-01 : f32
    %4 = vector.broadcast %cst : f32 to vector<1x256xf32>
    %5 = arith.mulf %4, %2 : vector<1x256xf32>
    %6 = arith.subf %0, %5 : vector<1x256xf32>
    %cst_4 = arith.constant 5.000000e-01 : f32
    %7 = vector.broadcast %cst_4 : f32 to vector<1x256xf32>
    %8 = arith.mulf %7, %3 : vector<1x256xf32>
    %9 = arith.subf %1, %8 : vector<1x256xf32>
    %cst_5 = arith.constant 5.000000e-01 : f32
    %10 = vector.broadcast %cst_5 : f32 to vector<1x256xf32>
    %11 = arith.mulf %10, %2 : vector<1x256xf32>
    %12 = arith.addf %0, %11 : vector<1x256xf32>
    %cst_6 = arith.constant 5.000000e-01 : f32
    %13 = vector.broadcast %cst_6 : f32 to vector<1x256xf32>
    %14 = arith.mulf %13, %3 : vector<1x256xf32>
    %15 = arith.addf %1, %14 : vector<1x256xf32>
    %c0_7 = arith.constant 0 : index
    %c0_8 = arith.constant 0 : index
    %c0_9 = arith.constant 0 : index
    %16 = vector.load %arg1[%c0_7, %c0_8, %c0_9] : memref<1x4x5xf32, #tpu.memory_space<vmem>>, vector<1x4x5xf32>
    %17 = vector.shape_cast %16 : vector<1x4x5xf32> to vector<4x5xf32>
    %18 = vector.extract_strided_slice %17 {offsets = [0, 0], sizes = [4, 1], strides = [1, 1]} : vector<4x5xf32> to vector<4x1xf32>
    %19 = vector.extract_strided_slice %17 {offsets = [0, 1], sizes = [4, 1], strides = [1, 1]} : vector<4x5xf32> to vector<4x1xf32>
    %20 = vector.extract_strided_slice %17 {offsets = [0, 2], sizes = [4, 1], strides = [1, 1]} : vector<4x5xf32> to vector<4x1xf32>
    %21 = vector.extract_strided_slice %17 {offsets = [0, 3], sizes = [4, 1], strides = [1, 1]} : vector<4x5xf32> to vector<4x1xf32>
    %22 = vector.broadcast %18 : vector<4x1xf32> to vector<4x256xf32>
    %23 = vector.broadcast %6 : vector<1x256xf32> to vector<4x256xf32>
    %24 = arith.maximumf %22, %23 : vector<4x256xf32>
    %25 = vector.broadcast %19 : vector<4x1xf32> to vector<4x256xf32>
    %26 = vector.broadcast %9 : vector<1x256xf32> to vector<4x256xf32>
    %27 = arith.maximumf %25, %26 : vector<4x256xf32>
    %28 = vector.broadcast %20 : vector<4x1xf32> to vector<4x256xf32>
    %29 = vector.broadcast %12 : vector<1x256xf32> to vector<4x256xf32>
    %30 = arith.minimumf %28, %29 : vector<4x256xf32>
    %31 = vector.broadcast %21 : vector<4x1xf32> to vector<4x256xf32>
    %32 = vector.broadcast %15 : vector<1x256xf32> to vector<4x256xf32>
    %33 = arith.minimumf %31, %32 : vector<4x256xf32>
    %34 = arith.subf %30, %24 : vector<4x256xf32>
    %cst_10 = arith.constant 0.000000e+00 : f32
    %35 = vector.broadcast %cst_10 : f32 to vector<4x256xf32>
    %36 = arith.maximumf %34, %35 : vector<4x256xf32>
    %37 = arith.subf %33, %27 : vector<4x256xf32>
    %cst_11 = arith.constant 0.000000e+00 : f32
    %38 = vector.broadcast %cst_11 : f32 to vector<4x256xf32>
    %39 = arith.maximumf %37, %38 : vector<4x256xf32>
    %40 = arith.mulf %36, %39 : vector<4x256xf32>
    %41 = arith.subf %20, %18 : vector<4x1xf32>
    %42 = arith.subf %21, %19 : vector<4x1xf32>
    %43 = arith.mulf %41, %42 : vector<4x1xf32>
    %44 = arith.subf %12, %6 : vector<1x256xf32>
    %45 = arith.subf %15, %9 : vector<1x256xf32>
    %46 = arith.mulf %44, %45 : vector<1x256xf32>
    %47 = vector.broadcast %43 : vector<4x1xf32> to vector<4x256xf32>
    %48 = vector.broadcast %46 : vector<1x256xf32> to vector<4x256xf32>
    %49 = arith.addf %47, %48 : vector<4x256xf32>
    %50 = arith.subf %49, %40 : vector<4x256xf32>
    %51 = arith.divf %40, %50 : vector<4x256xf32>
    %52 = tpu.iota {dimensions = array<i32: 1>} : vector<4x256xi32>
    %53 = tpu.iota {dimensions = array<i32: 0>} : vector<4x256xi32>
    %cst_12 = arith.constant dense<0xFF800000> : vector<4xf32>
    %54 = vector.multi_reduction <maximumf>, %51, %cst_12 [1] : vector<4x256xf32> to vector<4xf32>
    %55 = vector.shape_cast %54 : vector<4xf32> to vector<4x1xf32>
    %56 = vector.broadcast %55 : vector<4x1xf32> to vector<4x256xf32>
    %57 = arith.cmpf oeq, %51, %56 : vector<4x256xf32>
    %c256_i32 = arith.constant 256 : i32
    %58 = vector.broadcast %c256_i32 : i32 to vector<4x256xi32>
    %59 = arith.select %57, %52, %58 : vector<4x256xi1>, vector<4x256xi32>
    %cst_13 = arith.constant dense<2147483647> : vector<4xi32>
    %60 = vector.multi_reduction <minsi>, %59, %cst_13 [1] : vector<4x256xi32> to vector<4xi32>
    %61 = vector.shape_cast %60 : vector<4xi32> to vector<4x1xi32>
    %cst_14 = arith.constant dense<0xFF800000> : vector<256xf32>
    %62 = vector.multi_reduction <maximumf>, %51, %cst_14 [0] : vector<4x256xf32> to vector<256xf32>
    %63 = vector.shape_cast %62 : vector<256xf32> to vector<1x256xf32>
    %64 = vector.broadcast %63 : vector<1x256xf32> to vector<4x256xf32>
    %65 = arith.cmpf oeq, %51, %64 : vector<4x256xf32>
    %c4_i32 = arith.constant 4 : i32
    %66 = vector.broadcast %c4_i32 : i32 to vector<4x256xi32>
    %67 = arith.select %65, %53, %66 : vector<4x256xi1>, vector<4x256xi32>
    %cst_15 = arith.constant dense<2147483647> : vector<256xi32>
    %68 = vector.multi_reduction <minsi>, %67, %cst_15 [0] : vector<4x256xi32> to vector<256xi32>
    %69 = vector.shape_cast %68 : vector<256xi32> to vector<1x256xi32>
    %70 = vector.broadcast %61 : vector<4x1xi32> to vector<4x256xi32>
    %71 = arith.cmpi eq, %52, %70 : vector<4x256xi32>
    %72 = arith.extui %71 : vector<4x256xi1> to vector<4x256xi32>
    %73 = arith.sitofp %72 : vector<4x256xi32> to vector<4x256xf32>
    %cst_16 = arith.constant dense<0xFF800000> : vector<256xf32>
    %74 = vector.multi_reduction <maximumf>, %73, %cst_16 [0] : vector<4x256xf32> to vector<256xf32>
    %75 = vector.shape_cast %74 : vector<256xf32> to vector<1x256xf32>
    %cst_17 = arith.constant 5.000000e-01 : f32
    %76 = vector.broadcast %cst_17 : f32 to vector<1x256xf32>
    %77 = arith.cmpf ogt, %75, %76 : vector<1x256xf32>
    %c-1_i32 = arith.constant -1 : i32
    %78 = vector.broadcast %c-1_i32 : i32 to vector<4x256xi32>
    %79 = arith.select %71, %53, %78 : vector<4x256xi1>, vector<4x256xi32>
    %cst_18 = arith.constant dense<-2147483648> : vector<256xi32>
    %80 = vector.multi_reduction <maxsi>, %79, %cst_18 [0] : vector<4x256xi32> to vector<256xi32>
    %81 = vector.shape_cast %80 : vector<256xi32> to vector<1x256xi32>
    %cst_19 = arith.constant 2.000000e+00 : f32
    %82 = vector.broadcast %cst_19 : f32 to vector<1x256xf32>
    %83 = arith.select %77, %82, %63 : vector<1x256xi1>, vector<1x256xf32>
    %84 = arith.select %77, %81, %69 : vector<1x256xi1>, vector<1x256xi32>
    %85 = vector.broadcast %84 : vector<1x256xi32> to vector<4x256xi32>
    %86 = arith.cmpi eq, %53, %85 : vector<4x256xi32>
    %87 = arith.extui %86 : vector<4x256xi1> to vector<4x256xi32>
    %88 = arith.sitofp %87 : vector<4x256xi32> to vector<4x256xf32>
    %89 = vector.extract_strided_slice %17 {offsets = [0, 0], sizes = [4, 1], strides = [1, 1]} : vector<4x5xf32> to vector<4x1xf32>
    %90 = vector.broadcast %89 : vector<4x1xf32> to vector<4x256xf32>
    %91 = arith.mulf %88, %90 : vector<4x256xf32>
    %cst_20 = arith.constant dense<0.000000e+00> : vector<256xf32>
    %92 = vector.multi_reduction <add>, %91, %cst_20 [0] : vector<4x256xf32> to vector<256xf32>
    %93 = vector.shape_cast %92 : vector<256xf32> to vector<1x256xf32>
    %94 = vector.extract_strided_slice %17 {offsets = [0, 1], sizes = [4, 1], strides = [1, 1]} : vector<4x5xf32> to vector<4x1xf32>
    %95 = vector.broadcast %94 : vector<4x1xf32> to vector<4x256xf32>
    %96 = arith.mulf %88, %95 : vector<4x256xf32>
    %cst_21 = arith.constant dense<0.000000e+00> : vector<256xf32>
    %97 = vector.multi_reduction <add>, %96, %cst_21 [0] : vector<4x256xf32> to vector<256xf32>
    %98 = vector.shape_cast %97 : vector<256xf32> to vector<1x256xf32>
    %99 = vector.extract_strided_slice %17 {offsets = [0, 2], sizes = [4, 1], strides = [1, 1]} : vector<4x5xf32> to vector<4x1xf32>
    %100 = vector.broadcast %99 : vector<4x1xf32> to vector<4x256xf32>
    %101 = arith.mulf %88, %100 : vector<4x256xf32>
    %cst_22 = arith.constant dense<0.000000e+00> : vector<256xf32>
    %102 = vector.multi_reduction <add>, %101, %cst_22 [0] : vector<4x256xf32> to vector<256xf32>
    %103 = vector.shape_cast %102 : vector<256xf32> to vector<1x256xf32>
    %104 = vector.extract_strided_slice %17 {offsets = [0, 3], sizes = [4, 1], strides = [1, 1]} : vector<4x5xf32> to vector<4x1xf32>
    %105 = vector.broadcast %104 : vector<4x1xf32> to vector<4x256xf32>
    %106 = arith.mulf %88, %105 : vector<4x256xf32>
    %cst_23 = arith.constant dense<0.000000e+00> : vector<256xf32>
    %107 = vector.multi_reduction <add>, %106, %cst_23 [0] : vector<4x256xf32> to vector<256xf32>
    %108 = vector.shape_cast %107 : vector<256xf32> to vector<1x256xf32>
    %109 = vector.extract_strided_slice %17 {offsets = [0, 4], sizes = [4, 1], strides = [1, 1]} : vector<4x5xf32> to vector<4x1xf32>
    %110 = vector.broadcast %109 : vector<4x1xf32> to vector<4x256xf32>
    %111 = arith.mulf %88, %110 : vector<4x256xf32>
    %cst_24 = arith.constant dense<0.000000e+00> : vector<256xf32>
    %112 = vector.multi_reduction <add>, %111, %cst_24 [0] : vector<4x256xf32> to vector<256xf32>
    %113 = vector.shape_cast %112 : vector<256xf32> to vector<1x256xf32>
    %cst_25 = arith.constant 1.000000e+00 : f32
    %114 = vector.broadcast %cst_25 : f32 to vector<1x256xf32>
    %115 = arith.addf %113, %114 : vector<1x256xf32>
    %cst_26 = arith.constant 5.000000e-01 : f32
    %116 = vector.broadcast %cst_26 : f32 to vector<1x256xf32>
    %117 = arith.cmpf olt, %83, %116 : vector<1x256xf32>
    %cst_27 = arith.constant 0.000000e+00 : f32
    %118 = vector.broadcast %cst_27 : f32 to vector<1x256xf32>
    %119 = arith.select %117, %118, %115 : vector<1x256xi1>, vector<1x256xf32>
    %cst_28 = arith.constant 5.000000e-01 : f32
    %120 = vector.broadcast %cst_28 : f32 to vector<1x256xf32>
    %121 = arith.cmpf ogt, %119, %120 : vector<1x256xf32>
    %122 = arith.extui %121 : vector<1x256xi1> to vector<1x256xi32>
    %123 = arith.sitofp %122 : vector<1x256xi32> to vector<1x256xf32>
    %124 = vector.shape_cast %123 : vector<1x256xf32> to vector<1x1x256xf32>
    %cst_29 = arith.constant dense<0.000000e+00> : vector<1xf32>
    %125 = vector.multi_reduction <add>, %124, %cst_29 [1, 2] : vector<1x1x256xf32> to vector<1xf32>
    %126 = vector.shape_cast %125 : vector<1xf32> to vector<1x1x1xf32>
    %127 = vector.extract %126[0, 0, 0] : f32 from vector<1x1x1xf32>
    %128 = arith.addf %93, %103 : vector<1x256xf32>
    %cst_30 = arith.constant 5.000000e-01 : f32
    %129 = vector.broadcast %cst_30 : f32 to vector<1x256xf32>
    %130 = arith.mulf %128, %129 : vector<1x256xf32>
    %131 = arith.subf %130, %0 : vector<1x256xf32>
    %cst_31 = arith.constant 1.000000e-01 : f32
    %132 = vector.broadcast %cst_31 : f32 to vector<1x256xf32>
    %133 = arith.mulf %132, %2 : vector<1x256xf32>
    %134 = arith.divf %131, %133 : vector<1x256xf32>
    %135 = arith.addf %98, %108 : vector<1x256xf32>
    %cst_32 = arith.constant 5.000000e-01 : f32
    %136 = vector.broadcast %cst_32 : f32 to vector<1x256xf32>
    %137 = arith.mulf %135, %136 : vector<1x256xf32>
    %138 = arith.subf %137, %1 : vector<1x256xf32>
    %cst_33 = arith.constant 1.000000e-01 : f32
    %139 = vector.broadcast %cst_33 : f32 to vector<1x256xf32>
    %140 = arith.mulf %139, %3 : vector<1x256xf32>
    %141 = arith.divf %138, %140 : vector<1x256xf32>
    %142 = arith.subf %103, %93 : vector<1x256xf32>
    %143 = arith.divf %142, %2 : vector<1x256xf32>
    %144 = math.log %143 : vector<1x256xf32>
    %cst_34 = arith.constant 2.000000e-01 : f32
    %145 = vector.broadcast %cst_34 : f32 to vector<1x256xf32>
    %146 = arith.divf %144, %145 : vector<1x256xf32>
    %147 = arith.subf %108, %98 : vector<1x256xf32>
    %148 = arith.divf %147, %3 : vector<1x256xf32>
    %149 = math.log %148 : vector<1x256xf32>
    %cst_35 = arith.constant 2.000000e-01 : f32
    %150 = vector.broadcast %cst_35 : f32 to vector<1x256xf32>
    %151 = arith.divf %149, %150 : vector<1x256xf32>
    %152 = tpu.concatenate %134, %141, %146, %151 in 0 : vector<1x256xf32>, vector<1x256xf32>, vector<1x256xf32>, vector<1x256xf32> -> vector<4x256xf32>
    %c0_36 = arith.constant 0 : index
    %c0_37 = arith.constant 0 : index
    %c0_38 = arith.constant 0 : index
    %153 = vector.load %arg3[%c0_36, %c0_37, %c0_38] : memref<1x4x256xf32, #tpu.memory_space<vmem>>, vector<1x4x256xf32>
    %154 = vector.shape_cast %153 : vector<1x4x256xf32> to vector<4x256xf32>
    %155 = arith.subf %154, %152 : vector<4x256xf32>
    %156 = math.absf %155 : vector<4x256xf32>
    %cst_39 = arith.constant 1.000000e+00 : f32
    %157 = vector.broadcast %cst_39 : f32 to vector<4x256xf32>
    %158 = arith.cmpf olt, %156, %157 : vector<4x256xf32>
    %cst_40 = arith.constant 5.000000e-01 : f32
    %159 = vector.broadcast %cst_40 : f32 to vector<4x256xf32>
    %160 = arith.mulf %159, %155 : vector<4x256xf32>
    %161 = arith.mulf %160, %155 : vector<4x256xf32>
    %cst_41 = arith.constant 5.000000e-01 : f32
    %162 = vector.broadcast %cst_41 : f32 to vector<4x256xf32>
    %163 = arith.subf %156, %162 : vector<4x256xf32>
    %164 = arith.select %158, %161, %163 : vector<4x256xi1>, vector<4x256xf32>
    %cst_42 = arith.constant 0.000000e+00 : f32
    %165 = vector.shape_cast %121 : vector<1x256xi1> to vector<1x256xi1>
    %166 = vector.broadcast %165 : vector<1x256xi1> to vector<4x256xi1>
    %167 = vector.broadcast %cst_42 : f32 to vector<4x256xf32>
    %168 = arith.select %166, %164, %167 : vector<4x256xi1>, vector<4x256xf32>
    %169 = vector.shape_cast %168 : vector<4x256xf32> to vector<1x4x256xf32>
    %cst_43 = arith.constant dense<0.000000e+00> : vector<1xf32>
    %170 = vector.multi_reduction <add>, %169, %cst_43 [1, 2] : vector<1x4x256xf32> to vector<1xf32>
    %171 = vector.shape_cast %170 : vector<1xf32> to vector<1x1x1xf32>
    %172 = vector.extract %171[0, 0, 0] : f32 from vector<1x1x1xf32>
    %c0_44 = arith.constant 0 : index
    %c0_45 = arith.constant 0 : index
    %c0_46 = arith.constant 0 : index
    %173 = vector.load %arg4[%c0_44, %c0_45, %c0_46] : memref<1x21x256xf32, #tpu.memory_space<vmem>>, vector<1x21x256xf32>
    %174 = vector.shape_cast %173 : vector<1x21x256xf32> to vector<21x256xf32>
    %cst_47 = arith.constant dense<0xFF800000> : vector<256xf32>
    %175 = vector.multi_reduction <maximumf>, %174, %cst_47 [0] : vector<21x256xf32> to vector<256xf32>
    %176 = vector.shape_cast %175 : vector<256xf32> to vector<1x256xf32>
    %177 = vector.broadcast %176 : vector<1x256xf32> to vector<21x256xf32>
    %178 = arith.subf %174, %177 : vector<21x256xf32>
    %179 = math.exp %178 : vector<21x256xf32>
    %cst_48 = arith.constant dense<0.000000e+00> : vector<256xf32>
    %180 = vector.multi_reduction <add>, %179, %cst_48 [0] : vector<21x256xf32> to vector<256xf32>
    %181 = vector.shape_cast %180 : vector<256xf32> to vector<1x256xf32>
    %182 = math.log %181 : vector<1x256xf32>
    %183 = arith.addf %182, %176 : vector<1x256xf32>
    %184 = tpu.iota {dimensions = array<i32: 0>} : vector<21x256xi32>
    %185 = arith.fptosi %119 : vector<1x256xf32> to vector<1x256xi32>
    %186 = vector.broadcast %185 : vector<1x256xi32> to vector<21x256xi32>
    %187 = arith.cmpi eq, %184, %186 : vector<21x256xi32>
    %cst_49 = arith.constant 0.000000e+00 : f32
    %188 = vector.broadcast %cst_49 : f32 to vector<21x256xf32>
    %189 = arith.select %187, %174, %188 : vector<21x256xi1>, vector<21x256xf32>
    %cst_50 = arith.constant dense<0.000000e+00> : vector<256xf32>
    %190 = vector.multi_reduction <add>, %189, %cst_50 [0] : vector<21x256xf32> to vector<256xf32>
    %191 = vector.shape_cast %190 : vector<256xf32> to vector<1x256xf32>
    %192 = arith.subf %183, %191 : vector<1x256xf32>
    %cst_51 = arith.constant 0.000000e+00 : f32
    %193 = vector.broadcast %cst_51 : f32 to vector<1x256xf32>
    %194 = arith.select %121, %193, %192 : vector<1x256xi1>, vector<1x256xf32>
    %195 = tpu.transpose %194, [1, 0] : vector<1x256xf32> -> vector<256x1xf32>
    %c0_52 = arith.constant 0 : index
    %c0_53 = arith.constant 0 : index
    %196 = vector.load %arg6[%c0_52, %c0_53] : memref<256x1xf32, #tpu.memory_space<vmem>>, vector<256x1xf32>
    tpu.vector_store %arg6[%c0_52, %c0_53], %195 {strides = array<i32>} : memref<256x1xf32, #tpu.memory_space<vmem>>, vector<256x1xf32>,
    %197 = tpu.iota {dimensions = array<i32: 1>} : vector<1x256xi32>
    %cst_54 = arith.constant 1.000000e+00 : f32
    %198 = vector.broadcast %cst_54 : f32 to vector<1x128xf32>
    %cst_55 = arith.constant 0.000000e+00 : f32
    %199 = vector.broadcast %cst_55 : f32 to vector<1x256xf32>
    %c0_i32 = arith.constant 0 : i32
    %c128_i32 = arith.constant 128 : i32
    %200 = arith.muli %c0_i32, %c128_i32 : i32
    %201 = tpu.assume_multiple %200, 128 : i32
    %202 = arith.index_cast %201 : i32 to index
    %c0_56 = arith.constant 0 : index
    %203 = vector.load %arg6[%202, %c0_56] : memref<256x1xf32, #tpu.memory_space<vmem>>, vector<128x1xf32>
    %204 = tpu.iota {dimensions = array<i32: 0>} : vector<128x1xi32>
    %205 = vector.broadcast %201 : i32 to vector<128x1xi32>
    %206 = arith.addi %205, %204 : vector<128x1xi32>
    %207 = vector.broadcast %203 : vector<128x1xf32> to vector<128x256xf32>
    %208 = vector.broadcast %194 : vector<1x256xf32> to vector<128x256xf32>
    %209 = arith.cmpf ogt, %207, %208 : vector<128x256xf32>
    %210 = vector.broadcast %203 : vector<128x1xf32> to vector<128x256xf32>
    %211 = vector.broadcast %194 : vector<1x256xf32> to vector<128x256xf32>
    %212 = arith.cmpf oeq, %210, %211 : vector<128x256xf32>
    %213 = vector.broadcast %206 : vector<128x1xi32> to vector<128x256xi32>
    %214 = vector.broadcast %197 : vector<1x256xi32> to vector<128x256xi32>
    %215 = arith.cmpi slt, %213, %214 : vector<128x256xi32>
    %216 = arith.andi %212, %215 : vector<128x256xi1>
    %217 = arith.ori %209, %216 : vector<128x256xi1>
    %218 = arith.extui %217 : vector<128x256xi1> to vector<128x256xi32>
    %219 = arith.sitofp %218 : vector<128x256xi32> to vector<128x256xf32>
    %cst_57 = arith.constant dense<0.000000e+00> : vector<1x256xf32>
    %220 = tpu.matmul %198, %219, %cst_57 {dimension_numbers = #tpu.dot_dimension_numbers<[1], [0], [0], [1], [0, 0, 1, 1], [], []>} : vector<1x128xf32>, vector<128x256xf32>, vector<1x256xf32> -> vector<1x256xf32>
    %221 = arith.addf %199, %220 : vector<1x256xf32>
    %c1_i32 = arith.constant 1 : i32
    %c128_i32_58 = arith.constant 128 : i32
    %222 = arith.muli %c1_i32, %c128_i32_58 : i32
    %223 = tpu.assume_multiple %222, 128 : i32
    %224 = arith.index_cast %223 : i32 to index
    %c0_59 = arith.constant 0 : index
    %225 = vector.load %arg6[%224, %c0_59] : memref<256x1xf32, #tpu.memory_space<vmem>>, vector<128x1xf32>
    %226 = tpu.iota {dimensions = array<i32: 0>} : vector<128x1xi32>
    %227 = vector.broadcast %223 : i32 to vector<128x1xi32>
    %228 = arith.addi %227, %226 : vector<128x1xi32>
    %229 = vector.broadcast %225 : vector<128x1xf32> to vector<128x256xf32>
    %230 = vector.broadcast %194 : vector<1x256xf32> to vector<128x256xf32>
    %231 = arith.cmpf ogt, %229, %230 : vector<128x256xf32>
    %232 = vector.broadcast %225 : vector<128x1xf32> to vector<128x256xf32>
    %233 = vector.broadcast %194 : vector<1x256xf32> to vector<128x256xf32>
    %234 = arith.cmpf oeq, %232, %233 : vector<128x256xf32>
    %235 = vector.broadcast %228 : vector<128x1xi32> to vector<128x256xi32>
    %236 = vector.broadcast %197 : vector<1x256xi32> to vector<128x256xi32>
    %237 = arith.cmpi slt, %235, %236 : vector<128x256xi32>
    %238 = arith.andi %234, %237 : vector<128x256xi1>
    %239 = arith.ori %231, %238 : vector<128x256xi1>
    %240 = arith.extui %239 : vector<128x256xi1> to vector<128x256xi32>
    %241 = arith.sitofp %240 : vector<128x256xi32> to vector<128x256xf32>
    %cst_60 = arith.constant dense<0.000000e+00> : vector<1x256xf32>
    %242 = tpu.matmul %198, %241, %cst_60 {dimension_numbers = #tpu.dot_dimension_numbers<[1], [0], [0], [1], [0, 0, 1, 1], [], []>} : vector<1x128xf32>, vector<128x256xf32>, vector<1x256xf32> -> vector<1x256xf32>
    %243 = arith.addf %221, %242 : vector<1x256xf32>
    %c2_i32 = arith.constant 2 : i32
    %cst_61 = arith.constant 3.000000e+00 : f32
    %244 = arith.mulf %127, %cst_61 : f32
    %cst_62 = arith.constant 2.560000e+02 : f32
    %245 = arith.minimumf %244, %cst_62 : f32
    %246 = vector.broadcast %245 : f32 to vector<1x256xf32>
    %247 = arith.cmpf olt, %243, %246 : vector<1x256xf32>
    %248 = arith.ori %121, %247 : vector<1x256xi1>
    %cst_63 = arith.constant 0.000000e+00 : f32
    %249 = vector.broadcast %cst_63 : f32 to vector<1x256xf32>
    %250 = arith.select %248, %192, %249 : vector<1x256xi1>, vector<1x256xf32>
    %251 = vector.shape_cast %250 : vector<1x256xf32> to vector<1x1x256xf32>
    %cst_64 = arith.constant dense<0.000000e+00> : vector<1xf32>
    %252 = vector.multi_reduction <add>, %251, %cst_64 [1, 2] : vector<1x1x256xf32> to vector<1xf32>
    %253 = vector.shape_cast %252 : vector<1xf32> to vector<1x1x1xf32>
    %254 = vector.extract %253[0, 0, 0] : f32 from vector<1x1x1xf32>
    %255 = vector.broadcast %172 : f32 to vector<1x1xf32>
    %256 = vector.broadcast %254 : f32 to vector<1x1xf32>
    %257 = vector.broadcast %127 : f32 to vector<1x1xf32>
    %258 = tpu.concatenate %255, %256, %257 in 1 : vector<1x1xf32>, vector<1x1xf32>, vector<1x1xf32> -> vector<1x3xf32>
    %c0_65 = arith.constant 0 : index
    %c0_66 = arith.constant 0 : index
    %c0_67 = arith.constant 0 : index
    %259 = vector.load %arg5[%c0_65, %c0_66, %c0_67] : memref<1x1x3xf32, #tpu.memory_space<vmem>>, vector<1x1x3xf32>
    %260 = vector.shape_cast %259 : vector<1x1x3xf32> to vector<1x3xf32>
    %261 = vector.shape_cast %258 : vector<1x3xf32> to vector<1x1x3xf32>
    tpu.vector_store %arg5[%c0_65, %c0_66, %c0_67], %261 {strides = array<i32>} : memref<1x1x3xf32, #tpu.memory_space<vmem>>, vector<1x1x3xf32>,
    return
  }
  func.func @transform_0(%arg0: i32) -> (i32, i32, i32) {
    %c0_i32 = arith.constant 0 : i32
    %c0_i32_0 = arith.constant 0 : i32
    %c0_i32_1 = arith.constant 0 : i32
    return %arg0, %c0_i32, %c0_i32_0 : i32, i32, i32
  }
  func.func @transform_1(%arg0: i32) -> (i32, i32) {
    %c0_i32 = arith.constant 0 : i32
    %c0_i32_0 = arith.constant 0 : i32
    %c0_i32_1 = arith.constant 0 : i32
    return %c0_i32, %c0_i32_0 : i32, i32
  }
  func.func @transform_2(%arg0: i32) -> (i32, i32, i32) {
    %c0_i32 = arith.constant 0 : i32
    %c0_i32_0 = arith.constant 0 : i32
    %c0_i32_1 = arith.constant 0 : i32
    return %arg0, %c0_i32, %c0_i32_0 : i32, i32, i32
  }
  func.func @transform_3(%arg0: i32) -> (i32, i32, i32) {
    %c0_i32 = arith.constant 0 : i32
    %c0_i32_0 = arith.constant 0 : i32
    %c0_i32_1 = arith.constant 0 : i32
    return %arg0, %c0_i32, %c0_i32_0 : i32, i32, i32
  }
  func.func @transform_4(%arg0: i32) -> (i32, i32, i32) {
    %c0_i32 = arith.constant 0 : i32
    %c0_i32_0 = arith.constant 0 : i32
    %c0_i32_1 = arith.constant 0 : i32
    return %arg0, %c0_i32, %c0_i32_0 : i32, i32, i32
  }
}

</mosaic_0001>

<bundles_post_ra>
// kernel: multibox_loss.1
= control target key start
LH: loop header
LB: loop body
LE: loop exit
PB: predicated region body
PF: predicated region fallthrough
CT: control target
= control target key end

     0   :  { %s2168_s15 = smov 0   ;;  %s3580_s0 = inlined_call_operand.vmem [shape: f32[2,4,5], index: 0, kind: input, shape index: {}]   ;;  %s3581_s1 = inlined_call_operand.vmem [shape: f32[4,256], index: 1, kind: input, shape index: {}]   ;;  %s3582_s2 = inlined_call_operand.vmem [shape: f32[2,4,256], index: 2, kind: input, shape index: {}]   ;;  %s3583_s3 = inlined_call_operand.vmem [shape: f32[2,21,256], index: 3, kind: input, shape index: {}]   ;;  %s3584_s4 = inlined_call_operand.vmem [shape: f32[2,1,3], index: 4, kind: output, shape index: {}]  }
   0x1 LB: > { %s1894_s16 = sadd.s32 4294967295, %s2131_s15   ;;  %p1898_p0 = scmp.ge.s32.totalorder %s2131_s15, 1  ;;  %s2131_s15 = sphi %s2168_s15, %s14_s15  }
   0x2   : > { %p181_p1 = scmp.lt.s32.totalorder %s2131_s15, 3 }
   0x4   : > { %p182_p2 = pnand %p1898_p0, %p181_p1 }
   0x6   : > { %185 = sbr.rel (%p182_p2) target bundleno = 1717 (0x6b5), region = 36 }
   0xb   : > { %p214_p3 = scmp.lt.s32.totalorder %s1894_s16, 1  ;;  %v3585_v0 = vmov 0   ;;  %v2134_v1 = vmov 2   ;;  %s2135_s21 = smov 2   ;;  %v2136_v3 = vmov 1   ;;  %v2137_v4 = vmov 3  }
   0xc   : > { %2073 = vset.pattern.permute.xlu1 %v3585_v0  ;;  %2075 = vset.pattern.permute.xlu0 %v2134_v1  ;;  %v251_v5 = vlaneseq  ;;  %v2192_v6 = vld [vmem:[%s3581_s1 + $0x2] ss:$4 sm:$0x3]  ;;  %v2209_v11 = vld [vmem:[%s3581_s1 + $0x3] ss:$4 sm:$0x3] }
   0xd   : > { %s3791_s16 = smov (!%p214_p3, %s1894_s16), 1  ;;  %v2198_v8 = vmul.f32 0.1, %v2192_v6  ;;  %v2214_v12 = vld [vmem:[%s3581_s1] ss:$4 sm:$0x3] }
   0xe   : > { %s1899_s17 = sshll.u32 %s3791_s16, 2  ;;  %v2195_v7 = vshrl.u32 %v251_v5, 7  ;;  %v2217_v13 = vmul.f32 0.1, %v2209_v11  ;;  %s2138_s30 = smov 127   ;;  %v238_v32 = vmul.f32 0.5, %v2192_v6 }
   0xf   : > { %s217_s20 = scalar_lea.vmem %s3580_s0, %s1899_s17  ;;  %v2234_v20 = vld [vmem:[%s3581_s1 + $0x1] ss:$4 sm:$0x3]  ;;  %v240_v33 = vmul.f32 0.5, %v2209_v11  ;;  %vm365_vm0 = vcmask 1043456   ;;  %s2044_s5 = smul.u32 48, %s3791_s16 }
  0x10   : > { %v2183_v2 = vld [vmem:[%s217_s20] sm:$0xf]  ;;  %v2201_v9 = vsub.s32 0, %v2195_v7  ;;  %v2204_v10 = vsub.s32 1, %v2195_v7  ;;  %v239_v34 = vsub.f32 %v2214_v12, %v238_v32  ;;  %v242_v38 = vadd.f32 %v238_v32, %v2214_v12  ;;  %s2043_s9 = sshll.u32 %s3791_s16, 3  ;;  %s2142_s17 = smov 256.0  }
  0x11   : > { %324 = vrot.lane.b32.xlu0 %v2183_v2, %s2135_s21  ;;  %247 = vperm.xlu1 %2073, %v2183_v2   ;;  %v241_v35 = vsub.f32 %v2234_v20, %v240_v33  ;;  %v243_v37 = vadd.f32 %v2234_v20, %v240_v33  ;;  %s227_s8 = scalar_lea.vmem %s3583_s3, %s2044_s5  ;;  %vm768_vm5 = vcmask 1044480   ;;  %s222_s12 = scalar_lea.vmem %s3582_s2, %s2043_s9 }
  0x12   : > { %v614_v16 = vrot.slane %v2198_v8, %v2201_v9  ;;  %v618_v17 = vrot.slane %v2198_v8, %v2204_v10  ;;  %v664_v18 = vrot.slane %v2192_v6, %v2201_v9  ;;  %v668_v19 = vrot.slane %v2192_v6, %v2204_v10  ;;  %s230_s23 = scalar_lea.vmem %s3584_s4, %s3791_s16 }
  0x13   : > { %v647_v25 = vrot.slane %v2217_v13, %v2201_v9  ;;  %v651_v26 = vrot.slane %v2217_v13, %v2204_v10  ;;  %v688_v27 = vrot.slane %v2209_v11, %v2201_v9  ;;  %v692_v28 = vrot.slane %v2209_v11, %v2204_v10 }
  0x14   : > { %v254_v39 = vrot.slane %v239_v34, %v2201_v9  ;;  %v258_v40 = vrot.slane %v239_v34, %v2204_v10  ;;  %v271_v41 = vrot.slane %v241_v35, %v2201_v9  ;;  %v275_v42 = vrot.slane %v241_v35, %v2204_v10 }
  0x15   : > { %2074 = vset.pattern.permute.xlu1 %v2136_v3  ;;  %v305_v43 = vrot.slane %v243_v37, %v2201_v9  ;;  %v309_v44 = vrot.slane %v243_v37, %v2204_v10  ;;  %v288_v45 = vrot.slane %v242_v38, %v2201_v9  ;;  %v292_v46 = vrot.slane %v242_v38, %v2204_v10 }
  0x16   : > { %264 = vperm.xlu1 %2074, %v2183_v2   ;;  %v333_v49 = vsub.f32 %v242_v38, %v239_v34  ;;  %v334_v50 = vsub.f32 %v243_v37, %v241_v35 }
  0x18   : > { %v335_v59 = vmul.f32 %v334_v50, %v333_v49 }
  0x1a   : > { %2076 = vset.pattern.permute.xlu1 %v2137_v4  ;;  %v349_v3 = vrot.slane %v335_v59, %v2204_v10 }
  0x1b   : > { %298 = vperm.xlu1 %2076, %v2183_v2  }
  0x1f   : > { %2077 = vset.pattern.permute.xlu1 %v2134_v1  ;;  %v345_v1 = vrot.slane %v335_v59, %v2201_v9 }
  0x83   : > { %v325_v21 = vpop.permute.xlu0 %324 }
  0x84   : > { %v327_v24 = vsub.f32 %v2183_v2, %v325_v21 }
  0x86   : > { %329 = vrot.lane.b32.xlu0 %v327_v24, %s2138_s30 }
  0x8a   : > { %281 = vperm.xlu0 %2075, %v2183_v2  }
  0x8c   : > { %v2250_v31 = vpop.permute.xlu1 %247 }
  0x8d   : > { %v261_v51 = vmax.f32 %v2250_v31, %v254_v39  ;;  %v262_v52 = vmax.f32 %v2250_v31, %v258_v40 }
  0x91   : > { %v2256_v36 = vpop.permute.xlu1 %264 }
  0x92   : > { %v278_v53 = vmax.f32 %v2256_v36, %v271_v41  ;;  %v279_v54 = vmax.f32 %v2256_v36, %v275_v42 }
  0x96   : > { %v2268_v47 = vpop.permute.xlu1 %298 }
  0x97   : > { %v312_v55 = vmin.f32 %v2268_v47, %v305_v43  ;;  %v313_v56 = vmin.f32 %v2268_v47, %v309_v44 }
  0x99   : > { %v318_v60 = vsub.f32 %v312_v55, %v278_v53  ;;  %v319_v61 = vsub.f32 %v313_v56, %v279_v54 }
  0x9b   : > { %v320_v4 = vmax.f32 %v318_v60, 0.0  ;;  %v321_v21 = vmax.f32 %v319_v61, 0.0 }
  0xf8   : > { %v330_v29 = vpop.permute.xlu0 %329 }
  0xf9   : > { %v332_v30 = vmul.f32 %v330_v29, %v327_v24 }
  0xfb   : > { %338 = vperm.xlu1 %2077, %v332_v30  }
 0x105   : > { %v2270_v48 = vpop.permute.xlu0 %281 }
 0x106   : > { %v295_v57 = vmin.f32 %v2270_v48, %v288_v45  ;;  %v296_v58 = vmin.f32 %v2270_v48, %v292_v46  ;;  %v2291_v46 = vand.u32 127, %v251_v5 }
 0x108   : > { %v314_v62 = vsub.f32 %v295_v57, %v261_v51  ;;  %v315_v63 = vsub.f32 %v296_v58, %v262_v52  ;;  %v2294_v49 = vadd.s32 128, %v2291_v46  ;;  %v2139_v57 = vmov 4  }
 0x109   : > { %2078 = vset.pattern.permute.xlu0 %v2139_v57  ;;  %v3587_v58 = vmov 0.0  }
 0x10a   : > { %v316_v24 = vmax.f32 %v314_v62, 0.0  ;;  %v317_v29 = vmax.f32 %v315_v63, 0.0  ;;  %3595 = vst [vmem:[#allocation3_spill] sm:$0xff] %v2294_v49  ;;  %1787 = vmatprep.mubr.f32.mxu1 %v3587_v58  ;;  %1716 = vmatprep.mubr.f32.mxu0 %v3587_v58  ;;  %v2312_v63 = vld [vmem:[%s227_s8 + $0x20] sm:$0x1f] }
 0x10c   : > { %v322_v32 = vmul.f32 %v320_v4, %v316_v24  ;;  %v323_v33 = vmul.f32 %v321_v21, %v317_v29  ;;  %v2318_v4 = vld [vmem:[%s227_s8 + $0x28] sm:$0x1f]  ;;  %v2321_v24 = vld [vmem:[%s227_s8 + $0x10] sm:$0xff] }
 0x10d   : > { %v778_v29 = vsel %vm768_vm5, %v2318_v4, -inf }
 0x176   : > { %v339_v30 = vpop.permute.xlu1 %338 }
 0x177   : > { %v352_v34 = vadd.f32 %v345_v1, %v339_v30  ;;  %v353_v35 = vadd.f32 %v349_v3, %v339_v30  ;;  %v2314_v1 = vld [vmem:[%s227_s8] sm:$0xff]  ;;  %v769_v3 = vsel %vm768_vm5, %v2312_v63, -inf }
 0x178   : > { %v770_v21 = vmax.f32 %v2314_v1, %v769_v3 }
 0x179   : > { %v354_v37 = vsub.f32 %v352_v34, %v322_v32  ;;  %v355_v38 = vsub.f32 %v353_v35, %v323_v33 }
 0x17a   : > { %v771_v30 = vmax.f32 %v770_v21, %v2321_v24 }
 0x17b   : > { %2081 = vrcp.f32 %v354_v37 }
 0x17c   : > { %2083 = vrcp.f32 %v355_v38  ;;  %v772_v34 = vrot.slane %v771_v30, 4 }
 0x188   : > { %v2082_v39 = vpop.eup %2081 }
 0x189   : > { %v2084_v40 = vpop.eup %2083  ;;  %v2282_v41 = vmul.f32 %v2082_v39, %v322_v32  ;;  %v773_v39 = vmax.f32 %v771_v30, %v772_v34 }
 0x18a   : > { %v2284_v42 = vmul.f32 %v2084_v40, %v323_v33  ;;  %v2329_v33 = vld [vmem:[%s227_s8 + $0x18] sm:$0xff] }
 0x18b   : > { %v366_v43 = vsel %vm365_vm0, %v2282_v41, -inf }
 0x18c   : > { %v367_v44 = vsel %vm365_vm0, %v2284_v42, -inf  ;;  %v393_v37 = vrot.slane %v366_v43, 4 }
 0x18d   : > { %v368_v45 = vmax.f32 %v366_v43, %v367_v44  ;;  %v399_v38 = vrot.slane %v367_v44, 4 }
 0x18f   : > { %369 = vmax.xlane.f32.xlu0 %v368_v45  ;;  %v394_v45 = vmax.f32 %v366_v43, %v393_v37 }
 0x218   : > { %v370_v50 = vpop.xlane.xlu0 %369 }
 0x219   : > { %vm371_vm1 = vcmp.eq.f32.partialorder %v2282_v41, %v370_v50  ;;  %vm372_vm2 = vcmp.eq.f32.partialorder %v2284_v42, %v370_v50  ;;  %v400_v50 = vmax.f32 %v367_v44, %v399_v38 }
 0x21a   : > { %v373_v51 = vsel %vm371_vm1, %v2291_v46, 256  ;;  %v374_v52 = vsel %vm372_vm2, %v2294_v49, 256 }
 0x21b   : > { %v375_v53 = vsel %vm365_vm0, %v373_v51, 2147483647  ;;  %v376_v54 = vsel %vm365_vm0, %v374_v52, 2147483647  ;;  %v774_v51 = vrot.slane %v773_v39, 2 }
 0x21c   : > { %vm377_vm3 = vcmp.lt.s32.totalorder %v375_v53, %v376_v54 }
 0x21d   : > { %v378_v55 = vsel %vm377_vm3, %v375_v53, %v376_v54  ;;  %v395_v53 = vrot.slane %v394_v45, 2  ;;  %v401_v54 = vrot.slane %v400_v50, 2 }
 0x21e   : > { %v380_v5 = vshra.s32 %v378_v55, 16  ;;  %v379_v59 = vand.u32 65535, %v378_v55  ;;  %v775_v55 = vmax.f32 %v773_v39, %v774_v51 }
 0x21f   : > { %v402_v57 = vmax.f32 %v400_v50, %v401_v54 }
 0x220   : > { %v382_v56 = vcvt.s32.f32 %v380_v5  ;;  %v381_v61 = vcvt.s32.f32 %v379_v59  ;;  %v776_v59 = vrot.slane %v775_v55, 1 }
 0x221   : > { %v403_v3 = vrot.slane %v402_v57, 1 }
 0x222   : > { %383 = vmin.xlane.f32.xlu1 %v382_v56  ;;  %v2332_v21 = vmax.f32 %v775_v55, %v776_v59 }
 0x223   : > { %v2336_v30 = vmax.f32 %v402_v57, %v403_v3 }
 0x224   : > { %v787_v43 = vsub.f32 %v2314_v1, %v2332_v21  ;;  %v789_v34 = vsub.f32 %v2321_v24, %v2332_v21 }
 0x225   : > { %vm406_vm7 = vcmp.eq.f32.partialorder %v2284_v42, %v2336_v30 }
 0x226   : > { %v793_v37 = vmul.f32 1.442695, %v787_v43  ;;  %v408_v39 = vsel %vm406_vm7, %v2195_v7, 4 }
 0x227   : > { %v419_v42 = vsel %vm365_vm0, %v408_v39, 2147483647 }
 0x228   : > { %2085 = vpow2.f32 %v793_v37 }
 0x2ab   : > { %v2304_v60 = vpop.xlane.xlu1 %383 }
 0x2ac   : > { %vm385_vm4 = vcmp.eq.f32.partialorder %v382_v56, %v2304_v60  ;;  %v396_v56 = vmax.f32 %v394_v45, %v395_v53  ;;  %v797_v45 = vmul.f32 1.442695, %v789_v34 }
 0x2ad   : > { %v386_v62 = vsel %vm385_vm4, %v381_v61, inf }
 0x2ae   : > { %387 = vmin.xlane.f32.xlu0 %v386_v62  ;;  %v397_v62 = vrot.slane %v396_v56, 1  ;;  %2087 = vpow2.f32 %v797_v45 }
 0x2c4   : > { %548 = vperm.xlu0 %2078, %v2183_v2   ;;  %v2323_v2 = vld [vmem:[%s227_s8 + $0x8] sm:$0xff] }
 0x2c5   : > { %v779_v32 = vmax.f32 %v2323_v2, %v778_v29 }
 0x2c7   : > { %v780_v35 = vmax.f32 %v779_v32, %v2329_v33  ;;  %v2334_v32 = vmax.f32 %v396_v56, %v397_v62  ;;  %v2086_v62 = vpop.eup %2085 }
 0x2c8   : > { %v2088_v34 = vpop.eup %2087 }
 0x2c9   : > { %v781_v40 = vrot.slane %v780_v35, 4  ;;  %vm405_vm6 = vcmp.eq.f32.partialorder %v2282_v41, %v2334_v32  ;;  %v805_v8 = vadd.f32 %v2088_v34, %v2086_v62 }
 0x2ca   : > { %v407_v38 = vsel %vm405_vm6, %v2195_v7, 4 }
 0x2cb   : > { %v782_v52 = vmax.f32 %v780_v35, %v781_v40  ;;  %v791_v35 = vsub.f32 %v2312_v63, %v2332_v21  ;;  %v409_v41 = vsel %vm365_vm0, %v407_v38, 2147483647 }
 0x2cc   : > { %v410_v55 = vrot.slane %v409_v41, 4 }
 0x2cd   : > { %v783_v5 = vrot.slane %v782_v52, 2  ;;  %v801_v51 = vmul.f32 1.442695, %v791_v35 }
 0x2ce   : > { %vm411_vm8 = vcmp.lt.s32.totalorder %v409_v41, %v410_v55 }
 0x2cf   : > { %v784_v61 = vmax.f32 %v782_v52, %v783_v5  ;;  %2089 = vpow2.f32 %v801_v51  ;;  %v420_v5 = vrot.slane %v419_v42, 4  ;;  %v412_v57 = vsel %vm411_vm8, %v409_v41, %v410_v55 }
 0x2d0   : > { %v413_v3 = vrot.slane %v412_v57, 2 }
 0x2d1   : > { %v785_v29 = vrot.slane %v784_v61, 1  ;;  %vm421_vm9 = vcmp.lt.s32.totalorder %v419_v42, %v420_v5 }
 0x2d2   : > { %v422_v59 = vsel %vm421_vm9, %v419_v42, %v420_v5  ;;  %vm2370_vm10 = vcmp.lt.s32.totalorder %v412_v57, %v413_v3 }
 0x2d3   : > { %v2340_v44 = vmax.f32 %v784_v61, %v785_v29  ;;  %v390_v61 = vcvt.f32.s32 %v2304_v60  ;;  %v423_v29 = vrot.slane %v422_v59, 2 }
 0x2d5   : > { %v788_v40 = vsub.f32 %v2323_v2, %v2340_v44  ;;  %v790_v50 = vsub.f32 %v2329_v33, %v2340_v44  ;;  %v792_v52 = vsub.f32 %v2318_v4, %v2340_v44  ;;  %v391_v35 = vshll.u32 %v390_v61, 16 }
 0x2d6   : > { %vm2374_vm11 = vcmp.lt.s32.totalorder %v422_v59, %v423_v29 }
 0x2d7   : > { %v795_v53 = vmul.f32 1.442695, %v788_v40  ;;  %v799_v54 = vmul.f32 1.442695, %v790_v50  ;;  %v803_v56 = vmul.f32 1.442695, %v792_v52  ;;  %v425_v34 = vsel %vm2374_vm11, %v422_v59, %v423_v29 }
 0x2d8   : > { %v426_v59 = vrot.slane %v425_v34, 1 }
 0x2d9   : > { %2091 = vpow2.f32 %v795_v53 }
 0x2da   : > { %2093 = vpow2.f32 %v799_v54  ;;  %vm427_vm4 = vcmp.lt.s32.totalorder %v425_v34, %v426_v59 }
 0x2db   : > { %2095 = vpow2.f32 %v803_v56  ;;  %v428_v13 = vsel %vm427_vm4, %v425_v34, %v426_v59 }
 0x2dc   : > { %v2090_v38 = vpop.eup %2089  ;;  %2097 = vrcp.f32 %v614_v16 }
 0x2dd   : > { %2099 = vrcp.f32 %v618_v17  ;;  %v806_v16 = vsel %vm768_vm5, %v2090_v38, 0.0 }
 0x2de   : > { %2101 = vrcp.f32 %v664_v18 }
 0x2df   : > { %2103 = vrcp.f32 %v668_v19 }
 0x2e0   : > { %2105 = vrcp.f32 %v647_v25 }
 0x2e1   : > { %2107 = vrcp.f32 %v651_v26 }
 0x2e2   : > { %2109 = vrcp.f32 %v688_v27 }
 0x2e3   : > { %2111 = vrcp.f32 %v692_v28 }
 0x2e6   : > { %v2092_v45 = vpop.eup %2091 }
 0x2e7   : > { %v2094_v17 = vpop.eup %2093 }
 0x2e8   : > { %v2096_v55 = vpop.eup %2095 }
 0x2e9   : > { %v2400_v60 = vpop.eup %2097 }
 0x337   : > { %v388_v43 = vpop.xlane.xlu0 %387 }
 0x338   : > { %v389_v37 = vcvt.f32.s32 %v388_v43  ;;  %v415_v43 = vsel %vm2370_vm10, %v412_v57, %v413_v3 }
 0x339   : > { %v416_v57 = vrot.slane %v415_v43, 1 }
 0x33a   : > { %v392_v39 = vadd.s32 %v391_v35, %v389_v37  ;;  %v814_v35 = vadd.f32 %v2094_v17, %v2092_v45  ;;  %v2402_v17 = vpop.eup %2099 }
 0x33b   : > { %vm417_vm3 = vcmp.lt.s32.totalorder %v415_v43, %v416_v57 }
 0x33c   : > { %vm429_vm12 = vcmp.eq.s32.totalorder %v2291_v46, %v392_v39  ;;  %vm430_vm13 = vcmp.eq.s32.totalorder %v2294_v49, %v392_v39 }
 0x33d   : > { %v1906_v50 = vsel %vm429_vm12, 1.0, %v3587_v58  ;;  %v1907_v18 = vsel %vm430_vm13, 1.0, %v3587_v58  ;;  %v451_v51 = vsel %vm429_vm12, %v2195_v7, 4294967295  ;;  %v452_v41 = vsel %vm430_vm13, %v2195_v7, 4294967295 }
 0x33e   : > { %v435_v42 = vsel %vm365_vm0, %v1906_v50, -inf  ;;  %v442_v52 = vsel %vm365_vm0, %v1907_v18, -inf  ;;  %v453_v53 = vsel %vm365_vm0, %v451_v51, 2147483648  ;;  %v463_v54 = vsel %vm365_vm0, %v452_v41, 2147483648 }
 0x33f   : > { %v436_v5 = vrot.slane %v435_v42, 4  ;;  %v443_v56 = vrot.slane %v442_v52, 4  ;;  %v454_v61 = vrot.slane %v453_v53, 4  ;;  %v464_v62 = vrot.slane %v463_v54, 4 }
 0x340   : > { %v807_v18 = vadd.f32 %v806_v16, %v805_v8  ;;  %v815_v51 = vsel %vm768_vm5, %v2096_v55, 0.0  ;;  %v2404_v55 = vpop.eup %2101  ;;  %vm3592_vm12 = vcmask 1040384  }
 0x341   : > { %v437_v37 = vmax.f32 %v435_v42, %v436_v5  ;;  %v444_v38 = vmax.f32 %v442_v52, %v443_v56  ;;  %vm455_vm14 = vcmp.gt.s32.totalorder %v453_v53, %v454_v61  ;;  %vm465_vm15 = vcmp.gt.s32.totalorder %v463_v54, %v464_v62 }
 0x342   : > { %v456_v39 = vsel %vm455_vm14, %v453_v53, %v454_v61  ;;  %v466_v50 = vsel %vm465_vm15, %v463_v54, %v464_v62  ;;  %v808_v8 = vrot.slane %v807_v18, 4  ;;  %v816_v16 = vadd.f32 %v815_v51, %v814_v35 }
 0x343   : > { %v438_v41 = vrot.slane %v437_v37, 2  ;;  %v445_v0 = vrot.slane %v444_v38, 2  ;;  %v457_v6 = vrot.slane %v456_v39, 2  ;;  %v467_v19 = vrot.slane %v466_v50, 2 }
 0x344   : > { %v2413_v61 = vadd.f32 %v808_v8, %v807_v18  ;;  %v817_v62 = vrot.slane %v816_v16, 4  ;;  %v418_v35 = vsel %vm417_vm3, %v415_v43, %v416_v57  ;;  %vm725_vm15 = vcmask 1041408  }
 0x345   : > { %v439_v3 = vmax.f32 %v437_v37, %v438_v41  ;;  %v446_v29 = vmax.f32 %v444_v38, %v445_v0  ;;  %vm458_vm1 = vcmp.gt.s32.totalorder %v456_v39, %v457_v6  ;;  %vm468_vm2 = vcmp.gt.s32.totalorder %v466_v50, %v467_v19  ;;  %v2424_v38 = vpop.eup %2103 }
 0x346   : > { %v459_v40 = vsel %vm458_vm1, %v456_v39, %v457_v6  ;;  %v469_v45 = vsel %vm468_vm2, %v466_v50, %v467_v19  ;;  %v2438_v39 = vadd.f32 %v817_v62, %v816_v16  ;;  %v2456_v57 = vpop.eup %2105  ;;  %vm728_vm1 = vcmask 1042432  }
 0x347   : > { %v440_v42 = vrot.slane %v439_v3, 1  ;;  %v447_v52 = vrot.slane %v446_v29, 1  ;;  %v460_v53 = vrot.slane %v459_v40, 1  ;;  %v470_v54 = vrot.slane %v469_v45, 1 }
 0x349   : > { %v2409_v0 = vmax.f32 %v439_v3, %v440_v42  ;;  %v2411_v25 = vmax.f32 %v446_v29, %v447_v52  ;;  %vm461_vm6 = vcmp.gt.s32.totalorder %v459_v40, %v460_v53  ;;  %vm471_vm7 = vcmp.gt.s32.totalorder %v469_v45, %v470_v54 }
 0x34a   : > { %v462_v5 = vsel %vm461_vm6, %v459_v40, %v460_v53  ;;  %v472_v56 = vsel %vm471_vm7, %v469_v45, %v470_v54 }
 0x34b   : > { %vm449_vm8 = vcmp.gt.f32.partialorder %v2409_v0, 0.5  ;;  %vm450_vm9 = vcmp.gt.f32.partialorder %v2411_v25, 0.5 }
 0x34c   : > { %v475_v26 = vsel %vm449_vm8, %v462_v5, %v418_v35  ;;  %v476_v37 = vsel %vm450_vm9, %v472_v56, %v428_v13  ;;  %v2466_v56 = vpop.eup %2107 }
 0x34d   : > { %vm477_vm10 = vcmp.eq.s32.totalorder %v2195_v7, %v475_v26  ;;  %vm478_vm11 = vcmp.eq.s32.totalorder %v2195_v7, %v476_v37 }
 0x34e   : > { %v2432_v43 = vsel %vm477_vm10, 1.0, %v3587_v58  ;;  %v2435_v27 = vsel %vm478_vm11, 1.0, %v3587_v58  ;;  %vm3591_vm10 = vcmask 7168  }
 0x34f   : > { %v483_v50 = vmul.f32 %v2432_v43, %v2250_v31  ;;  %v484_v11 = vmul.f32 %v2435_v27, %v2250_v31  ;;  %v499_v28 = vmul.f32 %v2432_v43, %v2256_v36  ;;  %v500_v18 = vmul.f32 %v2435_v27, %v2256_v36 }
 0x350   : > { %v515_v51 = vmul.f32 %v2432_v43, %v2270_v48  ;;  %v516_v41 = vmul.f32 %v2435_v27, %v2270_v48  ;;  %v531_v6 = vmul.f32 %v2432_v43, %v2268_v47  ;;  %v532_v19 = vmul.f32 %v2435_v27, %v2268_v47 }
 0x351   : > { %v485_v31 = vsel %vm365_vm0, %v483_v50, 0.0  ;;  %v492_v59 = vsel %vm365_vm0, %v484_v11, 0.0  ;;  %v501_v36 = vsel %vm365_vm0, %v499_v28, 0.0  ;;  %v508_v3 = vsel %vm365_vm0, %v500_v18, 0.0 }
 0x352   : > { %v486_v29 = vrot.slane %v485_v31, 4  ;;  %v493_v40 = vrot.slane %v492_v59, 4  ;;  %v502_v45 = vrot.slane %v501_v36, 4  ;;  %v509_v48 = vrot.slane %v508_v3, 4 }
 0x353   : > { %v517_v8 = vsel %vm365_vm0, %v515_v51, 0.0  ;;  %v524_v16 = vsel %vm365_vm0, %v516_v41, 0.0  ;;  %v533_v47 = vsel %vm365_vm0, %v531_v6, 0.0  ;;  %v540_v42 = vsel %vm365_vm0, %v532_v19, 0.0 }
 0x354   : > { %v487_v52 = vadd.f32 %v486_v29, %v485_v31  ;;  %v494_v53 = vadd.f32 %v493_v40, %v492_v59  ;;  %v503_v54 = vadd.f32 %v502_v45, %v501_v36  ;;  %v510_v5 = vadd.f32 %v509_v48, %v508_v3  ;;  %v2110_v36 = vpop.eup %2109 }
 0x355   : > { %v518_v62 = vrot.slane %v517_v8, 4  ;;  %v525_v35 = vrot.slane %v524_v16, 4  ;;  %v534_v13 = vrot.slane %v533_v47, 4  ;;  %v541_v26 = vrot.slane %v540_v42, 4  ;;  %v2112_v48 = vpop.eup %2111 }
 0x356   : > { %v488_v37 = vrot.slane %v487_v52, 2  ;;  %v495_v50 = vrot.slane %v494_v53, 2  ;;  %v504_v11 = vrot.slane %v503_v54, 2  ;;  %v511_v28 = vrot.slane %v510_v5, 2 }
 0x357   : > { %v519_v18 = vadd.f32 %v518_v62, %v517_v8  ;;  %v526_v51 = vadd.f32 %v525_v35, %v524_v16  ;;  %v535_v41 = vadd.f32 %v534_v13, %v533_v47  ;;  %v542_v6 = vadd.f32 %v541_v26, %v540_v42  ;;  %v549_v47 = vpop.permute.xlu0 %548 }
 0x358   : > { %v489_v58 = vadd.f32 %v488_v37, %v487_v52  ;;  %v496_v19 = vadd.f32 %v495_v50, %v494_v53  ;;  %v505_v31 = vadd.f32 %v504_v11, %v503_v54  ;;  %v512_v59 = vadd.f32 %v511_v28, %v510_v5 }
 0x359   : > { %v520_v3 = vrot.slane %v519_v18, 2  ;;  %v527_v29 = vrot.slane %v526_v51, 2  ;;  %v536_v40 = vrot.slane %v535_v41, 2  ;;  %v543_v45 = vrot.slane %v542_v6, 2 }
 0x35a   : > { %v490_v23 = vrot.slane %v489_v58, 1  ;;  %v497_v22 = vrot.slane %v496_v19, 1  ;;  %v506_v15 = vrot.slane %v505_v31, 1  ;;  %v513_v14 = vrot.slane %v512_v59, 1 }
 0x35b   : > { %v521_v34 = vadd.f32 %v520_v3, %v519_v18  ;;  %v528_v49 = vadd.f32 %v527_v29, %v526_v51  ;;  %v537_v8 = vadd.f32 %v536_v40, %v535_v41  ;;  %v544_v16 = vadd.f32 %v543_v45, %v542_v6 }
 0x35c   : > { %v491_v42 = vadd.f32 %v490_v23, %v489_v58  ;;  %v498_v52 = vadd.f32 %v497_v22, %v496_v19  ;;  %v507_v53 = vadd.f32 %v506_v15, %v505_v31  ;;  %v514_v54 = vadd.f32 %v513_v14, %v512_v59 }
 0x35d   : > { %v522_v5 = vrot.slane %v521_v34, 1  ;;  %v529_v62 = vrot.slane %v528_v49, 1  ;;  %v538_v35 = vrot.slane %v537_v8, 1  ;;  %v545_v13 = vrot.slane %v544_v16, 1 }
 0x35e   : > { %v551_v26 = vmul.f32 %v2432_v43, %v549_v47  ;;  %v552_v37 = vmul.f32 %v2435_v27, %v549_v47  ;;  %v3600_v51 = vrot.slane %v2413_v61, 2  ;;  %v819_v22 = vrot.slane %v2438_v39, 2 }
 0x35f   : > { %v523_v50 = vadd.f32 %v522_v5, %v521_v34  ;;  %v530_v11 = vadd.f32 %v529_v62, %v528_v49  ;;  %v539_v28 = vadd.f32 %v538_v35, %v537_v8  ;;  %v546_v18 = vadd.f32 %v545_v13, %v544_v16 }
 0x360   : > { %v811_v41 = vadd.f32 %v3600_v51, %v2413_v61  ;;  %v553_v14 = vsel %vm365_vm0, %v551_v26, 0.0  ;;  %v560_v15 = vsel %vm365_vm0, %v552_v37, 0.0  ;;  %v3601_v16 = vrot.slane %v2214_v12, %v2201_v9 }
 0x361   : > { %v592_v23 = vadd.f32 %v523_v50, %v491_v42  ;;  %v593_v58 = vadd.f32 %v530_v11, %v498_v52  ;;  %v625_v6 = vadd.f32 %v539_v28, %v507_v53  ;;  %v626_v43 = vadd.f32 %v546_v18, %v514_v54 }
 0x362   : > { %v658_v19 = vsub.f32 %v523_v50, %v491_v42  ;;  %v659_v27 = vsub.f32 %v530_v11, %v498_v52  ;;  %v682_v34 = vsub.f32 %v539_v28, %v507_v53  ;;  %v683_v49 = vsub.f32 %v546_v18, %v514_v54 }
 0x363   : > { %v594_v31 = vmul.f32 0.5, %v592_v23  ;;  %v595_v59 = vmul.f32 0.5, %v593_v58  ;;  %v627_v3 = vmul.f32 0.5, %v625_v6  ;;  %v628_v29 = vmul.f32 0.5, %v626_v43 }
 0x364   : > { %v672_v61 = vmul.f32 %v2404_v55, %v658_v19  ;;  %v674_v40 = vmul.f32 %v2424_v38, %v659_v27  ;;  %v696_v45 = vmul.f32 %v2110_v36, %v682_v34  ;;  %v698_v8 = vmul.f32 %v2112_v48, %v683_v49 }
 0x365   : > { %v607_v47 = vsub.f32 %v594_v31, %v3601_v16  ;;  %v3602_v42 = vrot.slane %v2214_v12, %v2204_v10  ;;  %v3603_v53 = vrot.slane %v2234_v20, %v2201_v9  ;;  %v3604_v5 = vrot.slane %v2234_v20, %v2204_v10 }
 0x366   : > { %2113 = vlog2.f32 %v672_v61  ;;  %v820_v38 = vadd.f32 %v819_v22, %v2438_v39  ;;  %v554_v36 = vrot.slane %v553_v14, 4  ;;  %v561_v48 = vrot.slane %v560_v15, 4 }
 0x367   : > { %v608_v52 = vsub.f32 %v595_v59, %v3602_v42  ;;  %v640_v54 = vsub.f32 %v627_v3, %v3603_v53  ;;  %v641_v55 = vsub.f32 %v628_v29, %v3604_v5  ;;  %2115 = vlog2.f32 %v674_v40 }
 0x368   : > { %v622_v62 = vmul.f32 %v2400_v60, %v607_v47  ;;  %v555_v13 = vadd.f32 %v554_v36, %v553_v14  ;;  %v562_v26 = vadd.f32 %v561_v48, %v560_v15  ;;  %2117 = vlog2.f32 %v696_v45 }
 0x369   : > { %v624_v35 = vmul.f32 %v2402_v17, %v608_v52  ;;  %v655_v12 = vmul.f32 %v2456_v57, %v640_v54  ;;  %v657_v9 = vmul.f32 %v2466_v56, %v641_v55  ;;  %2119 = vlog2.f32 %v698_v8 }
 0x36a   : > { %v556_v20 = vrot.slane %v555_v13, 2  ;;  %v563_v37 = vrot.slane %v562_v26, 2  ;;  %v812_v50 = vrot.slane %v811_v41, 1  ;;  %v821_v11 = vrot.slane %v820_v38, 1 }
 0x36b   : > { %v707_v10 = vrot.slane %v655_v12, 7  ;;  %v708_v39 = vrot.slane %v657_v9, 7  ;;  %v473_v56 = vsel %vm449_vm8, 2.0, %v2334_v32  ;;  %v474_v15 = vsel %vm450_vm9, 2.0, %v2336_v30 }
 0x36c   : > { %v557_v60 = vadd.f32 %v556_v20, %v555_v13  ;;  %v564_v18 = vadd.f32 %v563_v37, %v562_v26  ;;  %v813_v22 = vadd.f32 %v812_v50, %v811_v41  ;;  %v822_v14 = vadd.f32 %v821_v11, %v820_v38 }
 0x36d   : > { %v723_v28 = vsel %vm3592_vm12, %v622_v62, %v707_v10  ;;  %v724_v17 = vsel %vm3592_vm12, %v624_v35, %v708_v39  ;;  %vm569_vm13 = vcmp.lt.f32.partialorder %v473_v56, 0.5  ;;  %vm570_vm14 = vcmp.lt.f32.partialorder %v474_v15, 0.5 }
 0x36e   : > { %v558_v57 = vrot.slane %v557_v60, 1  ;;  %v565_v51 = vrot.slane %v564_v18, 1  ;;  %2121 = vlog2.f32 %v813_v22  ;;  %v2508_v49 = vadd.s32 8, %v2195_v7 }
 0x36f   : > { %2123 = vlog2.f32 %v822_v14  ;;  %v2513_v59 = vadd.s32 16, %v2195_v7 }
 0x370   : > { %v559_v23 = vadd.f32 %v558_v57, %v557_v60  ;;  %v566_v58 = vadd.f32 %v565_v51, %v564_v18 }
 0x372   : > { %v567_v6 = vadd.f32 1.0, %v559_v23  ;;  %v568_v43 = vadd.f32 1.0, %v566_v58 }
 0x373   : > { %v2114_v19 = vpop.eup %2113 }
 0x374   : > { %v2116_v27 = vpop.eup %2115  ;;  %v2503_v41 = vsel %vm569_vm13, 0.0, %v567_v6  ;;  %v2505_v34 = vsel %vm570_vm14, 0.0, %v568_v43  ;;  %v676_v0 = vmul.f32 0.6931472, %v2114_v19 }
 0x375   : > { %v2118_v32 = vpop.eup %2117  ;;  %v2049_v30 = vtrunc.f32 %v2503_v41  ;;  %v2051_v25 = vtrunc.f32 %v2505_v34  ;;  %v678_v3 = vmul.f32 0.6931472, %v2116_v27  ;;  %vm3593_vm9 = vcmp.gt.f32.partialorder %v2505_v34, 0.5 }
 0x376   : > { %v2120_v31 = vpop.eup %2119  ;;  %v680_v29 = vmul.f32 5.0, %v676_v0  ;;  %v700_v61 = vmul.f32 0.6931472, %v2118_v32 }
 0x377   : > { %v2050_v40 = vcvt.f32.s32 %v2049_v30  ;;  %v2052_v45 = vcvt.f32.s32 %v2051_v25  ;;  %v681_v8 = vmul.f32 5.0, %v678_v3  ;;  %v702_v16 = vmul.f32 0.6931472, %v2120_v31 }
 0x378   : > { %v703_v47 = vmul.f32 5.0, %v700_v61  ;;  %v713_v42 = vrot.slane %v680_v29, 6 }
 0x379   : > { %vm833_vm2 = vcmp.eq.s32.totalorder %v2195_v7, %v2050_v40  ;;  %vm834_vm3 = vcmp.eq.s32.totalorder %v2195_v7, %v2052_v45  ;;  %vm835_vm4 = vcmp.eq.s32.totalorder %v2508_v49, %v2050_v40  ;;  %vm836_vm6 = vcmp.eq.s32.totalorder %v2508_v49, %v2052_v45 }
 0x37a   : > { %vm837_vm7 = vcmp.eq.s32.totalorder %v2513_v59, %v2050_v40  ;;  %vm838_vm8 = vcmp.eq.s32.totalorder %v2513_v59, %v2052_v45  ;;  %v839_v52 = vsel %vm833_vm2, %v2314_v1, 0.0  ;;  %v840_v53 = vsel %vm834_vm3, %v2323_v2, 0.0 }
 0x37b   : > { %v841_v54 = vsel %vm835_vm4, %v2321_v24, 0.0  ;;  %v842_v5 = vsel %vm836_vm6, %v2329_v33, 0.0  ;;  %v843_v55 = vsel %vm837_vm7, %v2312_v63, 0.0  ;;  %v844_v38 = vsel %vm838_vm8, %v2318_v4, 0.0  ;;  %v2122_v4 = vpop.eup %2121 }
 0x37c   : > { %v845_v36 = vadd.f32 %v841_v54, %v839_v52  ;;  %v846_v48 = vsel %vm768_vm5, %v843_v55, 0.0  ;;  %v854_v62 = vadd.f32 %v842_v5, %v840_v53  ;;  %v855_v35 = vsel %vm768_vm5, %v844_v38, 0.0  ;;  %v2124_v37 = vpop.eup %2123 }
 0x37d   : > { %v704_v12 = vmul.f32 5.0, %v702_v16  ;;  %v714_v13 = vrot.slane %v681_v8, 6  ;;  %v719_v26 = vrot.slane %v703_v47, 5  ;;  %v726_v1 = vsel %vm725_vm15, %v723_v28, %v713_v42 }
 0x37e   : > { %v847_v2 = vadd.f32 %v846_v48, %v845_v36  ;;  %v856_v9 = vadd.f32 %v855_v35, %v854_v62  ;;  %v824_v60 = vmul.f32 0.6931472, %v2122_v4  ;;  %v826_v18 = vmul.f32 0.6931472, %v2124_v37 }
 0x37f   : > { %v720_v24 = vrot.slane %v704_v12, 5  ;;  %v727_v33 = vsel %vm725_vm15, %v724_v17, %v714_v13  ;;  %v2532_v63 = vsel %vm728_vm1, %v726_v1, %v719_v26  ;;  %vm3594_vm5 = vcmp.gt.f32.partialorder %v2503_v41, 0.5 }
 0x380   : > { %v848_v10 = vrot.slane %v847_v2, 4  ;;  %v857_v20 = vrot.slane %v856_v9, 4  ;;  %v827_v14 = vadd.f32 %v824_v60, %v2332_v21  ;;  %v828_v56 = vadd.f32 %v826_v18, %v2340_v44 }
 0x381   : > { %v2535_v39 = vsel %vm728_vm1, %v727_v33, %v720_v24  ;;  %v3605_v44 = vmov 0  }
 0x382   : > { %v849_v50 = vadd.f32 %v848_v10, %v847_v2  ;;  %v858_v11 = vadd.f32 %v857_v20, %v856_v9  ;;  %v734_v28 = vcombine.low %v2532_v63, %v2535_v39 }
 0x384   : > { %v850_v57 = vrot.slane %v849_v50, 2  ;;  %v859_v51 = vrot.slane %v858_v11, 2 }
 0x386   : > { %v851_v17 = vadd.f32 %v850_v57, %v849_v50  ;;  %v860_v22 = vadd.f32 %v859_v51, %v858_v11 }
 0x388   : > { %v852_v15 = vrot.slane %v851_v17, 1  ;;  %v861_v23 = vrot.slane %v860_v22, 1 }
 0x38a   : > { %v853_v58 = vadd.f32 %v852_v15, %v851_v17  ;;  %v862_v6 = vadd.f32 %v861_v23, %v860_v22 }
 0x38c   : > { %v2541_v43 = vsub.f32 %v827_v14, %v853_v58  ;;  %v2543_v19 = vsub.f32 %v828_v56, %v862_v6 }
 0x38e   : > { %v2550_v27 = vsel %vm3594_vm5, 0.0, %v2541_v43  ;;  %v2555_v21 = vsel %vm3593_vm9, 0.0, %v2543_v19 }
 0x38f   : > { %899 = vxpose.xlu1.b32.start.end [1/1] (short) %v2555_v21, 128  ;;  %867 = vxpose.xlu0.b32.start.end [1/1] (short) %v2550_v27, 128 }
 0x3ad   : > { %2079 = vset.pattern.permute.xlu1 %v3605_v44 }
 0x3b8   : > { %2080 = vset.pattern.permute.xlu0 %v3605_v44 }
 0x40b   : > { %v915_v0 = vpop.trf.xlu1  ;;  %v883_v32 = vpop.trf.xlu0 }
 0x40c   : > { %948 = vst.msk [vmem:[#allocation2 + $0x80] sm:$0xff] %vm3591_vm10, %v915_v0  ;;  %932 = vst.msk [vmem:[#allocation2] sm:$0xff] %vm3591_vm10, %v883_v32 }
 0x40f   : > { %v916_v30 = vpop.trf.xlu1  ;;  %v884_v25 = vpop.trf.xlu0 }
 0x410   : > { %949 = vst.msk [vmem:[#allocation2 + $0x88] sm:$0xff] %vm3591_vm10, %v916_v30  ;;  %933 = vst.msk [vmem:[#allocation2 + $0x8] sm:$0xff] %vm3591_vm10, %v884_v25 }
 0x413   : > { %v917_v31 = vpop.trf.xlu1  ;;  %v885_v3 = vpop.trf.xlu0 }
 0x414   : > { %950 = vst.msk [vmem:[#allocation2 + $0x90] sm:$0xff] %vm3591_vm10, %v917_v31  ;;  %934 = vst.msk [vmem:[#allocation2 + $0x10] sm:$0xff] %vm3591_vm10, %v885_v3 }
 0x417   : > { %v918_v29 = vpop.trf.xlu1  ;;  %v886_v61 = vpop.trf.xlu0 }
 0x418   : > { %951 = vst.msk [vmem:[#allocation2 + $0x98] sm:$0xff] %vm3591_vm10, %v918_v29  ;;  %935 = vst.msk [vmem:[#allocation2 + $0x18] sm:$0xff] %vm3591_vm10, %v886_v61  ;;  %v965_v29 = vld [vmem:[#allocation2 + $0x8] sm:$0xff] }
 0x41b   : > { %v919_v40 = vpop.trf.xlu1  ;;  %v887_v45 = vpop.trf.xlu0  ;;  %v966_v31 = vld [vmem:[#allocation2 + $0x10] sm:$0xff] }
 0x41c   : > { %952 = vst.msk [vmem:[#allocation2 + $0xa0] sm:$0xff] %vm3591_vm10, %v919_v40  ;;  %936 = vst.msk [vmem:[#allocation2 + $0x20] sm:$0xff] %vm3591_vm10, %v887_v45  ;;  %v964_v40 = vld [vmem:[#allocation2] sm:$0xff] }
 0x41d   : > { %v731_v45 = vld [vmem:[%s222_s12] sm:$0xff] }
 0x41f   : > { %v920_v8 = vpop.trf.xlu1  ;;  %v888_v16 = vpop.trf.xlu0  ;;  %v967_v30 = vld [vmem:[#allocation2 + $0x18] sm:$0xff] }
 0x420   : > { %953 = vst.msk [vmem:[#allocation2 + $0xa8] sm:$0xff] %vm3591_vm10, %v920_v8  ;;  %937 = vst.msk [vmem:[#allocation2 + $0x28] sm:$0xff] %vm3591_vm10, %v888_v16  ;;  %v1318_v8 = vld [vmem:[#allocation2 + $0x98] sm:$0xff]  ;;  %v736_v16 = vsub.f32 %v731_v45, %v734_v28 }
 0x423   : > { %v921_v47 = vpop.trf.xlu1  ;;  %v889_v42 = vpop.trf.xlu0  ;;  %v968_v0 = vld [vmem:[#allocation2 + $0x20] sm:$0xff] }
 0x424   : > { %954 = vst.msk [vmem:[#allocation2 + $0xb0] sm:$0xff] %vm3591_vm10, %v921_v47  ;;  %938 = vst.msk [vmem:[#allocation2 + $0x30] sm:$0xff] %vm3591_vm10, %v889_v42  ;;  %v1319_v61 = vld [vmem:[#allocation2 + $0xa0] sm:$0xff]  ;;  %v1317_v47 = vld [vmem:[#allocation2 + $0x90] sm:$0xff]  ;;  %v737_v42 = vand.u32 2147483647, %v736_v16 }
 0x426   : > { %vm738_vm11 = vcmp.lt.f32.partialorder %v737_v42, 1.0 }
 0x427   : > { %v922_v52 = vpop.trf.xlu1  ;;  %v890_v53 = vpop.trf.xlu0  ;;  %v969_v6 = vld [vmem:[#allocation2 + $0x28] sm:$0xff] }
 0x428   : > { %955 = vst.msk [vmem:[#allocation2 + $0xb8] sm:$0xff] %vm3591_vm10, %v922_v52  ;;  %939 = vst.msk [vmem:[#allocation2 + $0x38] sm:$0xff] %vm3591_vm10, %v890_v53  ;;  %v1320_v3 = vld [vmem:[#allocation2 + $0xa8] sm:$0xff]  ;;  %v739_v52 = vmul.f32 0.5, %v736_v16 }
 0x429   : > { %v1316_v53 = vld [vmem:[#allocation2 + $0x88] sm:$0xff] }
 0x42b   : > { %v923_v54 = vpop.trf.xlu1  ;;  %v891_v5 = vpop.trf.xlu0  ;;  %v970_v23 = vld [vmem:[#allocation2 + $0x30] sm:$0xff] }
 0x42c   : > { %956 = vst.msk [vmem:[#allocation2 + $0xc0] sm:$0xff] %vm3591_vm10, %v923_v54  ;;  %940 = vst.msk [vmem:[#allocation2 + $0x40] sm:$0xff] %vm3591_vm10, %v891_v5  ;;  %v1321_v25 = vld [vmem:[#allocation2 + $0xb0] sm:$0xff]  ;;  %v740_v54 = vmul.f32 %v739_v52, %v736_v16  ;;  %v1912_v5 = vadd.f32 -0.5, %v737_v42  ;;  %v3614_v42 = vmov 0 }
 0x42f   : > { %v924_v55 = vpop.trf.xlu1  ;;  %v892_v38 = vpop.trf.xlu0  ;;  %v971_v56 = vld [vmem:[#allocation2 + $0x38] sm:$0xff] }
 0x430   : > { %957 = vst.msk [vmem:[#allocation2 + $0xc8] sm:$0xff] %vm3591_vm10, %v924_v55  ;;  %941 = vst.msk [vmem:[#allocation2 + $0x48] sm:$0xff] %vm3591_vm10, %v892_v38  ;;  %v1322_v32 = vld [vmem:[#allocation2 + $0xb8] sm:$0xff]  ;;  %v1315_v55 = vld [vmem:[#allocation2 + $0x80] sm:$0xff]  ;;  %v742_v38 = vsel %vm738_vm11, %v740_v54, %v1912_v5  ;;  %v3619_v5 = vmov 0 }
 0x431   : > { %v748_v63 = vsel %vm3594_vm5, %v742_v38, 0.0 }
 0x432   : > { %v750_v28 = vsel %vm365_vm0, %v748_v63, 0.0 }
 0x433   : > { %v925_v36 = vpop.trf.xlu1  ;;  %v893_v48 = vpop.trf.xlu0  ;;  %v1323_v62 = vld [vmem:[#allocation2 + $0xc0] sm:$0xff] }
 0x434   : > { %v972_v35 = vld [vmem:[#allocation2 + $0x40] sm:$0xff]  ;;  %958 = vst.msk [vmem:[#allocation2 + $0xd0] sm:$0xff] %vm3591_vm10, %v925_v36  ;;  %942 = vst.msk [vmem:[#allocation2 + $0x50] sm:$0xff] %vm3591_vm10, %v893_v48  ;;  %1390 = vperm.xlu1 %2079, %v1323_v62   ;;  %v746_v36 = vcombine.high %v742_v38, %v742_v38  ;;  %v3626_v38 = vmov 0 }
 0x435   : > { %1052 = vperm.xlu0 %2080, %v972_v35   ;;  %v3606_v35 = vmov 0.0  }
 0x436   : > { %v749_v48 = vsel %vm3593_vm9, %v746_v36, 0.0  ;;  %v3763_v36 = vmov 0 }
 0x437   : > { %v926_v12 = vpop.trf.xlu1  ;;  %v894_v13 = vpop.trf.xlu0  ;;  %v1324_v26 = vld [vmem:[#allocation2 + $0xc8] sm:$0xff]  ;;  %v751_v39 = vsel %vm365_vm0, %v749_v48, 0.0  ;;  %v3633_v48 = vmov 0 }
 0x438   : > { %v973_v1 = vld [vmem:[#allocation2 + $0x48] sm:$0xff]  ;;  %959 = vst.msk [vmem:[#allocation2 + $0xd8] sm:$0xff] %vm3591_vm10, %v926_v12  ;;  %943 = vst.msk [vmem:[#allocation2 + $0x58] sm:$0xff] %vm3591_vm10, %v894_v13  ;;  %1395 = vperm.xlu1 %2079, %v1324_v26   ;;  %v752_v62 = vadd.f32 %v751_v39, %v750_v28  ;;  %v1910_v12 = vsel %vm3594_vm5, 1.0, %v3606_v35  ;;  %v1911_v13 = vsel %vm3593_vm9, 1.0, %v3606_v35  ;;  %v3641_v39 = vmov 0 }
 0x439   : > { %1057 = vperm.xlu0 %2080, %v973_v1   ;;  %v580_v26 = vsel %vm3592_vm12, %v1910_v12, 0.0  ;;  %v581_v1 = vsel %vm3592_vm12, %v1911_v13, 0.0  ;;  %v3644_v13 = vmov 0 }
 0x43b   : > { %v895_v2 = vpop.trf.xlu0  ;;  %v1325_v9 = vld [vmem:[#allocation2 + $0xd0] sm:$0xff]  ;;  %v927_v33 = vpop.trf.xlu1 }
 0x43c   : > { %v974_v24 = vld [vmem:[#allocation2 + $0x50] sm:$0xff]  ;;  %944 = vst.msk [vmem:[#allocation2 + $0x60] sm:$0xff] %vm3591_vm10, %v895_v2  ;;  %1400 = vperm.xlu1 %2079, %v1325_v9   ;;  %960 = vst.msk [vmem:[#allocation2 + $0xe0] sm:$0xff] %vm3591_vm10, %v927_v33  ;;  %v582_v2 = vadd.f32 %v581_v1, %v580_v26  ;;  %v3647_v26 = vmov 0  ;;  %v3651_v1 = vmov 0 }
 0x43d   : > { %1062 = vperm.xlu0 %2080, %v974_v24  }
 0x43f   : > { %v896_v4 = vpop.trf.xlu0  ;;  %v1326_v10 = vld [vmem:[#allocation2 + $0xd8] sm:$0xff]  ;;  %v928_v20 = vpop.trf.xlu1 }
 0x440   : > { %945 = vst.msk [vmem:[#allocation2 + $0x68] sm:$0xff] %vm3591_vm10, %v896_v4  ;;  %1405 = vperm.xlu1 %2079, %v1326_v10   ;;  %961 = vst.msk [vmem:[#allocation2 + $0xe8] sm:$0xff] %vm3591_vm10, %v928_v20  ;;  %v975_v37 = vld [vmem:[#allocation2 + $0x58] sm:$0xff] }
 0x443   : > { %v897_v50 = vpop.trf.xlu0  ;;  %v929_v11 = vpop.trf.xlu1  ;;  %v1327_v60 = vld [vmem:[#allocation2 + $0xe0] sm:$0xff] }
 0x444   : > { %946 = vst.msk [vmem:[#allocation2 + $0x70] sm:$0xff] %vm3591_vm10, %v897_v50  ;;  %1067 = vperm.xlu1 %2079, %v975_v37   ;;  %962 = vst.msk [vmem:[#allocation2 + $0xf0] sm:$0xff] %vm3591_vm10, %v929_v11  ;;  %v976_v51 = vld [vmem:[#allocation2 + $0x60] sm:$0xff]  ;;  %v987_v11 = vadd.s32 80, %v2195_v7 }
 0x446   : > { %vm1174_vm2 = vcmp.lt.s32.totalorder %v987_v11, %v2291_v46 }
 0x447   : > { %v898_v18 = vpop.trf.xlu0  ;;  %v930_v57 = vpop.trf.xlu1  ;;  %v1328_v17 = vld [vmem:[#allocation2 + $0xe8] sm:$0xff] }
 0x448   : > { %947 = vst.msk [vmem:[#allocation2 + $0x78] sm:$0xff] %vm3591_vm10, %v898_v18  ;;  %1410 = vperm.xlu1 %2079, %v1327_v60   ;;  %963 = vst.msk [vmem:[#allocation2 + $0xf8] sm:$0xff] %vm3591_vm10, %v930_v57  ;;  %v977_v14 = vld [vmem:[#allocation2 + $0x68] sm:$0xff]  ;;  %v986_v60 = vadd.s32 72, %v2195_v7  ;;  %v2633_v18 = vadd.s32 64, %v2195_v7 }
 0x44a   : > { %vm1172_vm13 = vcmp.lt.s32.totalorder %v986_v60, %v2291_v46 }
 0x44b   : > { %v1329_v15 = vld [vmem:[#allocation2 + $0xf0] sm:$0xff] }
 0x44c   : > { %1072 = vperm.xlu1 %2079, %v976_v51   ;;  %v978_v58 = vld [vmem:[#allocation2 + $0x70] sm:$0xff] }
 0x44f   : > { %v979_v22 = vld [vmem:[#allocation2 + $0x78] sm:$0xff] }
 0x450   : > { %1415 = vperm.xlu1 %2079, %v1328_v17   ;;  %1087 = vperm.xlu0 %2080, %v979_v22   ;;  %v1330_v44 = vld [vmem:[#allocation2 + $0xf8] sm:$0xff]  ;;  %v2640_v17 = vadd.s32 120, %v2195_v7  ;;  %v989_v22 = vadd.s32 96, %v2195_v7 }
 0x452   : > { %vm1184_vm14 = vcmp.lt.s32.totalorder %v2640_v17, %v2291_v46  ;;  %vm1178_vm8 = vcmp.lt.s32.totalorder %v989_v22, %v2291_v46  ;;  %v1347_v28 = vadd.s32 128, %v2640_v17  ;;  %v2963_v17 = vadd.s32 40, %v2195_v7 }
 0x454   : > { %1077 = vperm.xlu1 %2079, %v977_v14   ;;  %1047 = vperm.xlu0 %2080, %v971_v56   ;;  %v988_v14 = vadd.s32 88, %v2195_v7  ;;  %v2646_v56 = vadd.s32 128, %v987_v11  ;;  %v1333_v11 = vadd.s32 128, %v2508_v49 }
 0x456   : > { %vm1176_vm12 = vcmp.lt.s32.totalorder %v988_v14, %v2291_v46 }
 0x458   : > { %1420 = vperm.xlu1 %2079, %v1329_v15   ;;  %1042 = vperm.xlu0 %2080, %v970_v23   ;;  %v990_v15 = vadd.s32 104, %v2195_v7  ;;  %v2650_v23 = vadd.s32 128, %v986_v60  ;;  %v3662_v60 = vmov 0 }
 0x45c   : > { %1082 = vperm.xlu1 %2079, %v978_v58   ;;  %1037 = vperm.xlu0 %2080, %v969_v6   ;;  %v2653_v58 = vadd.s32 128, %v2633_v18 }
 0x460   : > { %1425 = vperm.xlu1 %2079, %v1330_v44   ;;  %1032 = vperm.xlu0 %2080, %v968_v0   ;;  %v1344_v0 = vadd.s32 128, %v989_v22 }
 0x464   : > { %1385 = vperm.xlu1 %2079, %v1322_v32   ;;  %1027 = vperm.xlu0 %2080, %v967_v30   ;;  %v1343_v32 = vadd.s32 128, %v988_v14  ;;  %v2662_v30 = vadd.s32 112, %v2195_v7 }
 0x466   : > { %v1346_v45 = vadd.s32 128, %v2662_v30 }
 0x468   : > { %1380 = vperm.xlu1 %2079, %v1321_v25   ;;  %1022 = vperm.xlu0 %2080, %v966_v31   ;;  %v3607_v25 = vld [vmem:[#allocation3_spill] sm:$0xff]  ;;  %v2141_v31 = vmov 1.0  }
 0x46c   : > { %1375 = vperm.xlu1 %2079, %v1320_v3   ;;  %1017 = vperm.xlu0 %2080, %v965_v29   ;;  %v1345_v3 = vadd.s32 128, %v990_v15  ;;  %v2676_v29 = vadd.s32 56, %v2195_v7 }
 0x470   : > { %1370 = vperm.xlu1 %2079, %v1319_v61   ;;  %1012 = vperm.xlu0 %2080, %v964_v40  }
 0x474   : > { %1365 = vperm.xlu1 %2079, %v1318_v8   ;;  %v3161_v8 = vadd.s32 32, %v2195_v7 }
 0x478   : > { %1360 = vperm.xlu1 %2079, %v1317_v47  }
 0x47c   : > { %1355 = vperm.xlu1 %2079, %v1316_v53  }
 0x480   : > { %1350 = vperm.xlu1 %2079, %v1315_v55  }
 0x48f   : > { %753 = vadd.xlane.f32.xlu0 %v752_v62  ;;  %v2847_v62 = vadd.s32 48, %v2195_v7 }
 0x4a4   : > { %583 = vadd.xlane.f32.xlu1 %v582_v2  ;;  %v3655_v2 = vmov 0 }
 0x4af   : > { %v2614_v9 = vpop.permute.xlu1 %1390 }
 0x4b0   : > { %v2620_v4 = vpop.permute.xlu0 %1052 }
 0x4b1   : > { %vm1138_vm5 = vcmp.eq.f32.partialorder %v2620_v4, %v2550_v27 }
 0x4b3   : > { %v2616_v24 = vpop.permute.xlu1 %1395 }
 0x4b4   : > { %v2626_v37 = vpop.permute.xlu0 %1057 }
 0x4b7   : > { %v2618_v33 = vpop.permute.xlu1 %1400 }
 0x4b8   : > { %v2635_v57 = vpop.permute.xlu0 %1062 }
 0x4b9   : > { %vm1142_vm7 = vcmp.eq.f32.partialorder %v2635_v57, %v2550_v27 }
 0x4bb   : > { %v2622_v10 = vpop.permute.xlu1 %1405 }
 0x4bf   : > { %v2624_v20 = vpop.permute.xlu1 %1067 }
 0x4c0   : > { %vm1144_vm10 = vcmp.eq.f32.partialorder %v2624_v20, %v2550_v27 }
 0x4c1   : > { %vm2711_vm0 = vmand %vm1144_vm10, %vm1176_vm12 }
 0x4c3   : > { %v2628_v50 = vpop.permute.xlu1 %1410 }
 0x4c7   : > { %v2637_v51 = vpop.permute.xlu1 %1072 }
 0x4cb   : > { %v2655_v6 = vpop.permute.xlu1 %1415  ;;  %v1088_v44 = vpop.permute.xlu0 %1087 }
 0x4cc   : > { %vm1121_vm15 = vcmp.gt.f32.partialorder %v1088_v44, %v2555_v21  ;;  %vm1153_vm1 = vcmp.eq.f32.partialorder %v1088_v44, %v2555_v21  ;;  %vm1120_vm4 = vcmp.gt.f32.partialorder %v1088_v44, %v2550_v27  ;;  %vm1152_vm6 = vcmp.eq.f32.partialorder %v1088_v44, %v2550_v27 }
 0x4cd   : > { %vm1249_vm3 = vmor %vm1121_vm15, %vm1153_vm1  ;;  %vm1485_vm1 = vcmp.eq.f32.partialorder %v2628_v50, %v2555_v21  ;;  %vm1146_vm15 = vcmp.eq.f32.partialorder %v2637_v51, %v2550_v27  ;;  %v3704_v44 = vmov 0 }
 0x4ce   : > { %2009 = vmatprep.subr.msk.mxu1 %vm1249_vm3, %v2141_v31  ;;  %vm1216_vm11 = vmand %vm1152_vm6, %vm1184_vm14  ;;  %vm1517_vm14 = vcmp.lt.s32.totalorder %v1344_v0, %v3607_v25  ;;  %vm1140_vm3 = vcmp.eq.f32.partialorder %v2626_v37, %v2550_v27  ;;  %vm1515_vm6 = vcmp.lt.s32.totalorder %v1343_v32, %v3607_v25  ;;  %v1339_v0 = vadd.s32 128, %v2676_v29 }
 0x4cf   : > { %v1078_v61 = vpop.permute.xlu1 %1077  ;;  %vm1248_vm9 = vmor %vm1120_vm4, %vm1216_vm11  ;;  %v2682_v40 = vpop.permute.xlu0 %1047 }
 0x4d0   : > { %2010 = vmatpush1.msk.msra.mxu1 %vm1248_vm9, %v2141_v31  ;;  %vm2700_vm4 = vmand %vm1142_vm7, %vm1174_vm2  ;;  %vm1519_vm9 = vcmp.lt.s32.totalorder %v1345_v3, %v3607_v25  ;;  %vm3618_vm2 = vcmp.eq.f32.partialorder %v2622_v10, %v2555_v21  ;;  %v3719_v3 = vmov 0 }
 0x4d1   : > { %vm2729_vm12 = vmand %vm1485_vm1, %vm1517_vm14  ;;  %vm3621_vm14 = vcmp.lt.s32.totalorder %v990_v15, %v2291_v46  ;;  %v3685_v15 = vmov 0 }
 0x4d2   : > { %vm2738_vm10 = vmand %vm1140_vm3, %vm1172_vm13 }
 0x4d3   : > { %v3615_v42 = vsel %vm2738_vm10, 4294967295, %v3614_v42  ;;  %v2744_v52 = vpop.permute.xlu1 %1420  ;;  %v2746_v53 = vpop.permute.xlu0 %1042  ;;  %vm2759_vm3 = vmand %vm1146_vm15, %vm1178_vm8  ;;  %vm3622_vm8 = vcmp.eq.f32.partialorder %v1078_v61, %v2550_v27 }
 0x4d4   : > { %vm2768_vm1 = vmand %vm3618_vm2, %vm1515_vm6  ;;  %vm3625_vm2 = vcmp.lt.s32.totalorder %v2633_v18, %v2291_v46  ;;  %vm3635_vm6 = vcmp.eq.f32.partialorder %v1078_v61, %v2555_v21 }
 0x4d5   : > { %v3620_v5 = vsel %vm2768_vm1, 4294967295, %v3619_v5  ;;  %vm2779_vm15 = vmand %vm3622_vm8, %vm3621_vm14  ;;  %vm3631_vm14 = vcmp.lt.s32.totalorder %v2646_v56, %v3607_v25  ;;  %vm3632_vm8 = vcmp.eq.f32.partialorder %v2618_v33, %v2555_v21 }
 0x4d6   : > { %vm2792_vm7 = vmand %vm1138_vm5, %vm3625_vm2  ;;  %vm3628_vm5 = vcmp.eq.f32.partialorder %v2655_v6, %v2555_v21 }
 0x4d7   : > { %v3627_v38 = vsel %vm2792_vm7, 4294967295, %v3626_v38  ;;  %vm2809_vm2 = vmand %vm3628_vm5, %vm1519_vm9  ;;  %vm3636_vm9 = vcmp.gt.f32.partialorder %v1078_v61, %v2555_v21  ;;  %vm3639_vm7 = vcmp.eq.f32.partialorder %v2637_v51, %v2555_v21  ;;  %v1083_v35 = vpop.permute.xlu1 %1082  ;;  %v2851_v12 = vpop.permute.xlu0 %1037 }
 0x4d8   : > { %vm2819_vm13 = vmand %vm3632_vm8, %vm3631_vm14  ;;  %vm3640_vm14 = vcmp.gt.f32.partialorder %v2637_v51, %v2555_v21 }
 0x4d9   : > { %v3634_v48 = vsel %vm2819_vm13, 4294967295, %v3633_v48  ;;  %vm2829_vm5 = vmor %vm3636_vm9, %vm3635_vm6  ;;  %vm1150_vm13 = vcmp.eq.f32.partialorder %v1083_v35, %v2550_v27 }
 0x4da   : > { %vm2839_vm8 = vmor %vm3640_vm14, %vm3639_vm7  ;;  %vm3643_vm7 = vcmp.gt.f32.partialorder %v1078_v61, %v2550_v27  ;;  %vm3646_vm14 = vcmp.gt.f32.partialorder %v2637_v51, %v2550_v27 }
 0x4db   : > { %v3642_v39 = vsel %vm2839_vm8, 4294967295, %v3641_v39  ;;  %vm2857_vm9 = vmor %vm3643_vm7, %vm2779_vm15  ;;  %vm3649_vm7 = vcmp.lt.s32.totalorder %v2650_v23, %v3607_v25  ;;  %vm3650_vm8 = vcmp.eq.f32.partialorder %v2616_v24, %v2555_v21  ;;  %vm3653_vm15 = vcmp.eq.f32.partialorder %v2624_v20, %v2555_v21  ;;  %v1426_v22 = vpop.permute.xlu1 %1425  ;;  %v2969_v14 = vpop.permute.xlu0 %1032 }
 0x4dc   : > { %v3645_v13 = vsel %vm2857_vm9, 4294967295, %v3644_v13  ;;  %vm2866_vm11 = vmor %vm3646_vm14, %vm2759_vm3  ;;  %vm1119_vm3 = vcmp.gt.f32.partialorder %v1083_v35, %v2555_v21  ;;  %vm1151_vm14 = vcmp.eq.f32.partialorder %v1083_v35, %v2555_v21 }
 0x4dd   : > { %v3648_v26 = vsel %vm2866_vm11, 4294967295, %v3647_v26  ;;  %vm2882_vm1 = vmand %vm3650_vm8, %vm3649_vm7  ;;  %vm3654_vm11 = vcmp.gt.f32.partialorder %v2624_v20, %v2555_v21  ;;  %vm3657_vm8 = vcmp.lt.s32.totalorder %v1346_v45, %v3607_v25  ;;  %vm3658_vm7 = vcmp.eq.f32.partialorder %v2744_v52, %v2555_v21 }
 0x4de   : > { %v3652_v1 = vsel %vm2882_vm1, 4294967295, %v3651_v1  ;;  %vm2896_vm9 = vmor %vm3654_vm11, %vm3653_vm15  ;;  %vm3661_vm11 = vcmp.gt.f32.partialorder %v2624_v20, %v2550_v27  ;;  %v3727_v45 = vmov 0 }
 0x4df   : > { %v3656_v2 = vsel %vm2896_vm9, 4294967295, %v3655_v2  ;;  %vm2905_vm1 = vmand %vm3658_vm7, %vm3657_vm8  ;;  %vm3669_vm7 = vcmp.eq.f32.partialorder %v2635_v57, %v2555_v21  ;;  %vm3670_vm8 = vcmp.gt.f32.partialorder %v2635_v57, %v2555_v21  ;;  %v3079_v32 = vpop.permute.xlu1 %1385  ;;  %v3139_v61 = vpop.permute.xlu0 %1027 }
 0x4e0   : > { %vm1247_vm10 = vmor %vm1119_vm3, %vm1151_vm14  ;;  %vm3664_vm3 = vcmp.lt.s32.totalorder %v2653_v58, %v3607_v25  ;;  %vm3665_vm14 = vcmp.eq.f32.partialorder %v2614_v9, %v2555_v21  ;;  %v3694_v58 = vmov 0 }
 0x4e1   : > { %vm2916_vm15 = vmor %vm3661_vm11, %vm2711_vm0  ;;  %2011 = vmatprep.subr.msk.mxu1 %vm1247_vm10, %v2141_v31  ;;  %vm3668_vm0 = vcmp.lt.s32.totalorder %v2662_v30, %v2291_v46  ;;  %vm3673_vm10 = vcmp.gt.f32.partialorder %v2655_v6, %v2555_v21 }
 0x4e2   : > { %v3663_v60 = vsel %vm2916_vm15, 4294967295, %v3662_v60  ;;  %vm2932_vm6 = vmand %vm3665_vm14, %vm3664_vm3 }
 0x4e3   : > { %vm1214_vm11 = vmand %vm1150_vm13, %vm3668_vm0  ;;  %vm3698_vm13 = vcmp.eq.f32.partialorder %v2620_v4, %v2555_v21  ;;  %v3289_v55 = vpop.permute.xlu0 %1022 }
 0x4e4   : > { %vm2947_vm15 = vmor %vm3670_vm8, %vm3669_vm7  ;;  %vm3676_vm7 = vcmp.gt.f32.partialorder %v1083_v35, %v2550_v27  ;;  %vm3687_vm8 = vcmp.lt.s32.totalorder %v2676_v29, %v2291_v46 }
 0x4e5   : > { %vm2956_vm3 = vmor %vm3673_vm10, %vm2809_vm2  ;;  %vm3677_vm2 = vcmp.gt.f32.partialorder %v2635_v57, %v2550_v27  ;;  %vm3681_vm10 = vcmp.gt.f32.partialorder %v2626_v37, %v2555_v21  ;;  %v3682_v57 = vmov 0 }
 0x4e6   : > { %vm1246_vm14 = vmor %vm3676_vm7, %vm1214_vm11  ;;  %vm3684_vm11 = vcmp.gt.f32.partialorder %v2628_v50, %v2555_v21  ;;  %vm3692_vm7 = vnez %v3615_v42 }
 0x4e7   : > { %vm2976_vm0 = vmor %vm3677_vm2, %vm2700_vm4  ;;  %2012 = vmatpush1.msk.msra.mxu1 %vm1246_vm14, %v2141_v31  ;;  %vm1491_vm4 = vcmp.eq.f32.partialorder %v1426_v22, %v2555_v21  ;;  %vm3680_vm2 = vcmp.eq.f32.partialorder %v2626_v37, %v2555_v21 }
 0x4e8   : > { %vm2997_vm9 = vmor %vm3681_vm10, %vm3680_vm2  ;;  %vm3688_vm10 = vcmp.eq.f32.partialorder %v2682_v40, %v2550_v27  ;;  %2013 = vmatprep.subr.msk.mxu1 %vm2829_vm5, %v2141_v31  ;;  %vm3702_vm5 = vnez %v3620_v5  ;;  %v3287_v5 = vadd.s32 24, %v2195_v7 }
 0x4e9   : > { %v3683_v57 = vsel %vm2997_vm9, 4294967295, %v3682_v57  ;;  %vm3006_vm14 = vmor %vm3684_vm11, %vm2729_vm12  ;;  %vm3691_vm12 = vcmp.lt.s32.totalorder %v1347_v28, %v3607_v25  ;;  %v1336_v28 = vadd.s32 128, %v3161_v8 }
 0x4ea   : > { %v3686_v15 = vsel %vm3006_vm14, 4294967295, %v3685_v15  ;;  %vm3018_vm2 = vmand %vm3688_vm10, %vm3687_vm8  ;;  %vm3693_vm14 = vcmp.gt.f32.partialorder %v2626_v37, %v2550_v27  ;;  %vm3699_vm8 = vcmp.gt.f32.partialorder %v2620_v4, %v2555_v21 }
 0x4eb   : > { %vm1555_vm11 = vmand %vm1491_vm4, %vm3691_vm12  ;;  %vm3696_vm12 = vnez %v3645_v13  ;;  %vm3703_vm4 = vcmp.gt.f32.partialorder %v2622_v10, %v2555_v21 }
 0x4ec   : > { %vm3034_vm9 = vmor %vm3693_vm14, %vm3692_vm7  ;;  %2014 = vmatpush1.msk.msra.mxu1 %vm3696_vm12, %v2141_v31  ;;  %vm3697_vm7 = vcmp.gt.f32.partialorder %v1426_v22, %v2555_v21  ;;  %vm3709_vm12 = vcmp.gt.f32.partialorder %v2620_v4, %v2550_v27  ;;  %v3715_v4 = vmov 0 }
 0x4ed   : > { %v3695_v58 = vsel %vm3034_vm9, 4294967295, %v3694_v58  ;;  %vm1587_vm14 = vmor %vm3697_vm7, %vm1555_vm11  ;;  %vm3708_vm7 = vnez %v3627_v38 }
 0x4ee   : > { %vm3057_vm10 = vmor %vm3699_vm8, %vm3698_vm13  ;;  %vm3706_vm13 = vnez %v3642_v39  ;;  %1977 = vmatprep.subr.msk.mxu0 %vm1587_vm14, %v2141_v31  ;;  %vm1458_vm8 = vcmp.gt.f32.partialorder %v1426_v22, %v2550_v27  ;;  %vm3717_vm14 = vnez %v3634_v48  ;;  %v1337_v48 = vadd.s32 128, %v2963_v17  ;;  %v1018_v39 = vpop.permute.xlu0 %1017 }
 0x4ef   : > { %vm3066_vm9 = vmor %vm3703_vm4, %vm3702_vm5  ;;  %2015 = vmatprep.subr.msk.mxu1 %vm3706_vm13, %v2141_v31  ;;  %vm3707_vm5 = vcmp.gt.f32.partialorder %v2744_v52, %v2555_v21  ;;  %1978 = vmatpush1.msk.msra.mxu0 %vm1458_vm8, %v2141_v31 }
 0x4f0   : > { %v3705_v44 = vsel %vm3066_vm9, 4294967295, %v3704_v44  ;;  %vm1585_vm4 = vmor %vm3707_vm5, %vm2905_vm1  ;;  %vm3712_vm1 = vnez %v3648_v26  ;;  %vm3714_vm5 = vcmp.gt.f32.partialorder %v2682_v40, %v2555_v21  ;;  %vm3718_vm9 = vcmp.gt.f32.partialorder %v2618_v33, %v2555_v21 }
 0x4f1   : > { %vm3092_vm11 = vmor %vm3709_vm12, %vm3708_vm7  ;;  %2016 = vmatpush1.msk.msra.mxu1 %vm3712_vm1, %v2141_v31  ;;  %vm3713_vm12 = vcmp.eq.f32.partialorder %v2682_v40, %v2555_v21  ;;  %vm3721_vm1 = vcmp.lt.s32.totalorder %v2847_v62, %v2291_v46  ;;  %1979 = vmatprep.subr.msk.mxu0 %vm1585_vm4, %v2141_v31  ;;  %vm3729_vm4 = vnez %v3663_v60  ;;  %v1335_v26 = vadd.s32 128, %v3287_v5 }
 0x4f2   : > { %vm3112_vm7 = vmor %vm3714_vm5, %vm3713_vm12  ;;  %vm3722_vm12 = vcmp.eq.f32.partialorder %v2746_v53, %v2550_v27 }
 0x4f3   : > { %v3716_v4 = vsel %vm3112_vm7, 4294967295, %v3715_v4  ;;  %vm3121_vm13 = vmor %vm3718_vm9, %vm3717_vm14  ;;  %vm3725_vm9 = vnez %v3656_v2  ;;  %vm1456_vm14 = vcmp.gt.f32.partialorder %v2744_v52, %v2550_v27  ;;  %vm3731_vm7 = vcmp.gt.f32.partialorder %v2746_v53, %v2555_v21 }
 0x4f4   : > { %v3720_v3 = vsel %vm3121_vm13, 4294967295, %v3719_v3  ;;  %vm3133_vm5 = vmand %vm3722_vm12, %vm3721_vm1  ;;  %2017 = vmatprep.subr.msk.mxu1 %vm3725_vm9, %v2141_v31  ;;  %vm3726_vm1 = vcmp.gt.f32.partialorder %v2682_v40, %v2550_v27  ;;  %1980 = vmatpush1.msk.msra.mxu0 %vm1456_vm14, %v2141_v31  ;;  %vm3734_vm9 = vnez %v3652_v1  ;;  %vm1131_vm13 = vcmp.eq.f32.partialorder %v2969_v14, %v2555_v21 }
 0x4f5   : > { %vm3152_vm12 = vmor %vm3726_vm1, %vm3018_vm2  ;;  %2018 = vmatpush1.msk.msra.mxu1 %vm3729_vm4, %v2141_v31  ;;  %vm1454_vm2 = vcmp.gt.f32.partialorder %v2655_v6, %v2550_v27  ;;  %vm3730_vm1 = vcmp.eq.f32.partialorder %v2746_v53, %v2555_v21  ;;  %vm3735_vm4 = vcmp.gt.f32.partialorder %v2616_v24, %v2555_v21  ;;  %1981 = vmatprep.subr.msk.mxu0 %vm2956_vm3, %v2141_v31  ;;  %v3199_v6 = vpop.permute.xlu1 %1380  ;;  %v1334_v2 = vadd.s32 128, %v2513_v59 }
 0x4f6   : > { %v3728_v45 = vsel %vm3152_vm12, 4294967295, %v3727_v45  ;;  %vm3175_vm8 = vmor %vm3731_vm7, %vm3730_vm1  ;;  %2019 = vmatprep.subr.msk.mxu1 %vm2947_vm15, %v2141_v31  ;;  %vm3742_vm15 = vcmp.eq.f32.partialorder %v2851_v12, %v2550_v27  ;;  %1982 = vmatpush1.msk.msra.mxu0 %vm1454_vm2, %v2141_v31  ;;  %vm3751_vm2 = vnez %v3686_v15  ;;  %vm3755_vm3 = vnez %v3695_v58 }
 0x4f7   : > { %vm3184_vm12 = vmor %vm3735_vm4, %vm3734_vm9  ;;  %vm3738_vm9 = vcmp.gt.f32.partialorder %v2746_v53, %v2550_v27  ;;  %vm3741_vm4 = vcmp.lt.s32.totalorder %v2963_v17, %v2291_v46  ;;  %2020 = vmatpush1.msk.msra.mxu1 %vm2976_vm0, %v2141_v31  ;;  %v1338_v53 = vadd.s32 128, %v2847_v62  ;;  %vm3750_vm0 = vnez %v3683_v57  ;;  %1983 = vmatprep.subr.msk.mxu0 %vm3751_vm2, %v2141_v31 }
 0x4f8   : > { %vm3206_vm1 = vmor %vm3738_vm9, %vm3133_vm5  ;;  %vm3743_vm5 = vcmp.eq.f32.partialorder %v2851_v12, %v2555_v21  ;;  %vm3744_vm9 = vcmp.gt.f32.partialorder %v2851_v12, %v2555_v21  ;;  %2021 = vmatprep.subr.msk.mxu1 %vm3750_vm0, %v2141_v31 }
 0x4f9   : > { %vm1196_vm7 = vmand %vm3742_vm15, %vm3741_vm4  ;;  %vm3747_vm15 = vcmp.gt.f32.partialorder %v2614_v9, %v2555_v21  ;;  %2022 = vmatpush1.msk.msra.mxu1 %vm3755_vm3, %v2141_v31  ;;  %v3297_v38 = vpop.permute.xlu1 %1375 }
 0x4fa   : > { %vm3232_vm4 = vmor %vm3744_vm9, %vm3743_vm5  ;;  %vm1452_vm5 = vcmp.gt.f32.partialorder %v2628_v50, %v2550_v27  ;;  %vm3752_vm9 = vcmp.gt.f32.partialorder %v2851_v12, %v2550_v27  ;;  %v3757_v50 = vmov 0  ;;  %2023 = vmatprep.subr.msk.mxu1 %vm3057_vm10, %v2141_v31  ;;  %vm1129_vm10 = vcmp.eq.f32.partialorder %v3139_v61, %v2555_v21  ;;  %v1013_v12 = vpop.permute.xlu0 %1012 }
 0x4fb   : > { %vm3241_vm14 = vmor %vm3747_vm15, %vm2932_vm6  ;;  %1984 = vmatpush1.msk.msra.mxu0 %vm1452_vm5, %v2141_v31  ;;  %vm3760_vm15 = vcmp.eq.f32.partialorder %v3079_v32, %v2555_v21  ;;  %vm1450_vm5 = vcmp.gt.f32.partialorder %v2622_v10, %v2550_v27  ;;  %2024 = vmatpush1.msk.msra.mxu1 %vm3092_vm11, %v2141_v31  ;;  %vm3768_vm11 = vnez %v3720_v3 }
 0x4fc   : > { %vm3257_vm6 = vmor %vm3752_vm9, %vm1196_vm7  ;;  %vm3756_vm7 = vcmp.gt.f32.partialorder %v2969_v14, %v2555_v21  ;;  %vm3759_vm9 = vcmp.lt.s32.totalorder %v1339_v0, %v3607_v25 }
 0x4fd   : > { %vm3275_vm2 = vmor %vm3756_vm7, %vm1131_vm13  ;;  %vm3761_vm13 = vnez %v3705_v44  ;;  %v3361_v63 = vpop.permute.xlu1 %1370 }
 0x4fe   : > { %v3758_v50 = vsel %vm3275_vm2, 4294967295, %v3757_v50  ;;  %vm1539_vm0 = vmand %vm3760_vm15, %vm3759_vm9  ;;  %1985 = vmatprep.subr.msk.mxu0 %vm3761_vm13, %v2141_v31  ;;  %vm3762_vm15 = vcmp.gt.f32.partialorder %v3079_v32, %v2555_v21  ;;  %vm1505_vm9 = vcmp.lt.s32.totalorder %v1338_v53, %v3607_v25  ;;  %vm3767_vm13 = vnez %v3716_v4 }
 0x4ff   : > { %vm3304_vm7 = vmor %vm3762_vm15, %vm1539_vm0  ;;  %1986 = vmatpush1.msk.msra.mxu0 %vm1450_vm5, %v2141_v31  ;;  %vm3765_vm0 = vcmp.lt.s32.totalorder %v3161_v8, %v2291_v46  ;;  %vm3766_vm15 = vcmp.eq.f32.partialorder %v2969_v14, %v2550_v27  ;;  %2025 = vmatprep.subr.msk.mxu1 %vm3767_vm13, %v2141_v31  ;;  %vm1448_vm5 = vcmp.gt.f32.partialorder %v2618_v33, %v2550_v27 }
 0x500   : > { %v3764_v36 = vsel %vm3304_vm7, 4294967295, %v3763_v36  ;;  %vm1194_vm3 = vmand %vm3766_vm15, %vm3765_vm0  ;;  %vm1441_vm7 = vcmp.gt.f32.partialorder %v3199_v6, %v2555_v21  ;;  %1987 = vmatprep.subr.msk.mxu0 %vm3768_vm11, %v2141_v31  ;;  %vm3769_vm2 = vcmp.gt.f32.partialorder %v2969_v14, %v2550_v27  ;;  %vm3772_vm15 = vnez %v3728_v45 }
 0x501   : > { %vm3338_vm0 = vmor %vm3769_vm2, %vm1194_vm3  ;;  %2026 = vmatpush1.msk.msra.mxu1 %vm3772_vm15, %v2141_v31  ;;  %1988 = vmatpush1.msk.msra.mxu0 %vm1448_vm5, %v2141_v31  ;;  %vm3773_vm13 = vcmp.gt.f32.partialorder %v3139_v61, %v2555_v21  ;;  %vm1128_vm2 = vcmp.eq.f32.partialorder %v3139_v61, %v2550_v27  ;;  %vm1160_vm3 = vcmp.lt.s32.totalorder %v3287_v5, %v2291_v46  ;;  %v3424_v62 = vpop.permute.xlu1 %1365 }
 0x502   : > { %vm3350_vm11 = vmor %vm3773_vm13, %vm1129_vm10  ;;  %2027 = vmatprep.subr.msk.mxu1 %vm3175_vm8, %v2141_v31  ;;  %1989 = vmatprep.subr.msk.mxu0 %vm3184_vm12, %v2141_v31  ;;  %vm1446_vm10 = vcmp.gt.f32.partialorder %v2616_v24, %v2550_v27  ;;  %vm3776_vm5 = vcmp.eq.f32.partialorder %v3199_v6, %v2555_v21  ;;  %vm1096_vm13 = vcmp.gt.f32.partialorder %v3139_v61, %v2550_v27 }
 0x503   : > { %vm1537_vm15 = vmand %vm3776_vm5, %vm1505_vm9  ;;  %2028 = vmatpush1.msk.msra.mxu1 %vm3206_vm1, %v2141_v31  ;;  %1990 = vmatpush1.msk.msra.mxu0 %vm1446_vm10, %v2141_v31  ;;  %vm1095_vm12 = vcmp.gt.f32.partialorder %v3289_v55, %v2555_v21  ;;  %vm1127_vm9 = vcmp.eq.f32.partialorder %v3289_v55, %v2555_v21  ;;  %vm1471_vm5 = vcmp.eq.f32.partialorder %v3297_v38, %v2555_v21 }
 0x504   : > { %vm3382_vm8 = vmor %vm1441_vm7, %vm1537_vm15  ;;  %2029 = vmatprep.subr.msk.mxu1 %vm3232_vm4, %v2141_v31  ;;  %1991 = vmatprep.subr.msk.mxu0 %vm3241_vm14, %v2141_v31  ;;  %vm1444_vm1 = vcmp.gt.f32.partialorder %v2614_v9, %v2550_v27  ;;  %vm1503_vm10 = vcmp.lt.s32.totalorder %v1337_v48, %v3607_v25  ;;  %vm1439_vm15 = vcmp.gt.f32.partialorder %v3297_v38, %v2555_v21 }
 0x505   : > { %vm1192_vm7 = vmand %vm1128_vm2, %vm1160_vm3  ;;  %2030 = vmatpush1.msk.msra.mxu1 %vm3257_vm6, %v2141_v31  ;;  %1992 = vmatpush1.msk.msra.mxu0 %vm1444_vm1, %v2141_v31  ;;  %vm3781_vm4 = vnez %v3758_v50  ;;  %vm3782_vm6 = vnez %v3764_v36  ;;  %vm1442_vm2 = vcmp.gt.f32.partialorder %v3079_v32, %v2550_v27  ;;  %vm1158_vm1 = vcmp.lt.s32.totalorder %v2513_v59, %v2291_v46  ;;  %v1361_v13 = vpop.permute.xlu1 %1360 }
 0x506   : > { %vm3416_vm14 = vmor %vm1096_vm13, %vm1192_vm7  ;;  %2031 = vmatprep.subr.msk.mxu1 %vm3781_vm4, %v2141_v31  ;;  %1993 = vmatprep.subr.msk.mxu0 %vm3782_vm6, %v2141_v31  ;;  %vm1126_vm13 = vcmp.eq.f32.partialorder %v3289_v55, %v2550_v27  ;;  %vm1469_vm4 = vcmp.eq.f32.partialorder %v3361_v63, %v2555_v21  ;;  %vm1438_vm6 = vcmp.gt.f32.partialorder %v3297_v38, %v2550_v27  ;;  %v1332_v59 = vadd.s32 128, %v2195_v7 }
 0x507   : > { %vm3437_vm3 = vmor %vm1095_vm12, %vm1127_vm9  ;;  %2032 = vmatpush1.msk.msra.mxu1 %vm3338_vm0, %v2141_v31  ;;  %1994 = vmatpush1.msk.msra.mxu0 %vm1442_vm2, %v2141_v31  ;;  %vm1094_vm9 = vcmp.gt.f32.partialorder %v3289_v55, %v2550_v27  ;;  %vm1440_vm0 = vcmp.gt.f32.partialorder %v3199_v6, %v2550_v27 }
 0x508   : > { %vm1535_vm12 = vmand %vm1471_vm5, %vm1503_vm10  ;;  %2033 = vmatprep.subr.msk.mxu1 %vm3350_vm11, %v2141_v31  ;;  %1995 = vmatprep.subr.msk.mxu0 %vm3382_vm8, %v2141_v31  ;;  %vm1093_vm5 = vcmp.gt.f32.partialorder %v1018_v39, %v2555_v21  ;;  %vm1125_vm10 = vcmp.eq.f32.partialorder %v1018_v39, %v2555_v21  ;;  %vm1501_vm8 = vcmp.lt.s32.totalorder %v1336_v28, %v3607_v25 }
 0x509   : > { %vm1567_vm7 = vmor %vm1439_vm15, %vm1535_vm12  ;;  %2034 = vmatpush1.msk.msra.mxu1 %vm3416_vm14, %v2141_v31  ;;  %1996 = vmatpush1.msk.msra.mxu0 %vm1440_vm0, %v2141_v31  ;;  %vm1437_vm15 = vcmp.gt.f32.partialorder %v3361_v63, %v2555_v21  ;;  %vm1092_vm12 = vcmp.gt.f32.partialorder %v1018_v39, %v2550_v27  ;;  %vm1091_vm0 = vcmp.gt.f32.partialorder %v1013_v12, %v2555_v21  ;;  %v1356_v1 = vpop.permute.xlu1 %1355 }
 0x50a   : > { %vm1190_vm11 = vmand %vm1126_vm13, %vm1158_vm1  ;;  %2035 = vmatprep.subr.msk.mxu1 %vm3437_vm3, %v2141_v31  ;;  %1997 = vmatprep.subr.msk.mxu0 %vm1567_vm7, %v2141_v31  ;;  %vm1124_vm3 = vcmp.eq.f32.partialorder %v1018_v39, %v2550_v27  ;;  %vm1156_vm13 = vcmp.lt.s32.totalorder %v2508_v49, %v2291_v46  ;;  %vm1123_vm7 = vcmp.eq.f32.partialorder %v1013_v12, %v2555_v21 }
 0x50b   : > { %vm1222_vm14 = vmor %vm1094_vm9, %vm1190_vm11  ;;  %1998 = vmatpush1.msk.msra.mxu0 %vm1438_vm6, %v2141_v31  ;;  %vm1436_vm11 = vcmp.gt.f32.partialorder %v3361_v63, %v2550_v27  ;;  %vm1122_vm6 = vcmp.eq.f32.partialorder %v1013_v12, %v2550_v27 }
 0x50c   : > { %2036 = vmatpush1.msk.msra.mxu1 %vm1222_vm14, %v2141_v31  ;;  %vm1221_vm2 = vmor %vm1093_vm5, %vm1125_vm10  ;;  %vm1467_vm5 = vcmp.eq.f32.partialorder %v3424_v62, %v2555_v21 }
 0x50d   : > { %2037 = vmatprep.subr.msk.mxu1 %vm1221_vm2, %v2141_v31  ;;  %vm1533_vm1 = vmand %vm1469_vm4, %vm1501_vm8  ;;  %vm1499_vm4 = vcmp.lt.s32.totalorder %v1335_v26, %v3607_v25  ;;  %vm1435_vm8 = vcmp.gt.f32.partialorder %v3424_v62, %v2555_v21  ;;  %vm1154_vm2 = vcmp.lt.s32.totalorder %v2195_v7, %v2291_v46  ;;  %v1351_v46 = vpop.permute.xlu1 %1350 }
 0x50e   : > { %vm1565_vm9 = vmor %vm1437_vm15, %vm1533_vm1  ;;  %vm1465_vm1 = vcmp.eq.f32.partialorder %v1361_v13, %v2555_v21 }
 0x50f   : > { %1999 = vmatprep.subr.msk.mxu0 %vm1565_vm9, %v2141_v31  ;;  %vm1188_vm10 = vmand %vm1124_vm3, %vm1156_vm13  ;;  %vm1090_vm13 = vcmp.gt.f32.partialorder %v1013_v12, %v2550_v27  ;;  %vm1497_vm9 = vcmp.lt.s32.totalorder %v1334_v2, %v3607_v25 }
 0x510   : > { %vm1220_vm15 = vmor %vm1092_vm12, %vm1188_vm10  ;;  %2000 = vmatpush1.msk.msra.mxu0 %vm1436_vm11, %v2141_v31  ;;  %vm1434_vm10 = vcmp.gt.f32.partialorder %v3424_v62, %v2550_v27 }
 0x511   : > { %2038 = vmatpush1.msk.msra.mxu1 %vm1220_vm15, %v2141_v31  ;;  %vm1219_vm14 = vmor %vm1091_vm0, %vm1123_vm7  ;;  %vm1433_vm0 = vcmp.gt.f32.partialorder %v1361_v13, %v2555_v21 }
 0x512   : > { %2039 = vmatprep.subr.msk.mxu1 %vm1219_vm14, %v2141_v31  ;;  %vm1531_vm3 = vmand %vm1467_vm5, %vm1499_vm4  ;;  %vm1463_vm5 = vcmp.eq.f32.partialorder %v1356_v1, %v2555_v21  ;;  %vm1495_vm4 = vcmp.lt.s32.totalorder %v1333_v11, %v3607_v25 }
 0x513   : > { %vm1563_vm12 = vmor %vm1435_vm8, %vm1531_vm3  ;;  %vm1431_vm8 = vcmp.gt.f32.partialorder %v1356_v1, %v2555_v21  ;;  %vm1432_vm3 = vcmp.gt.f32.partialorder %v1361_v13, %v2550_v27 }
 0x514   : > { %2001 = vmatprep.subr.msk.mxu0 %vm1563_vm12, %v2141_v31  ;;  %vm1186_vm7 = vmand %vm1122_vm6, %vm1154_vm2  ;;  %vm1461_vm6 = vcmp.eq.f32.partialorder %v1351_v46, %v2555_v21  ;;  %vm1493_vm2 = vcmp.lt.s32.totalorder %v1332_v59, %v3607_v25 }
 0x515   : > { %vm1218_vm11 = vmor %vm1090_vm13, %vm1186_vm7  ;;  %2002 = vmatpush1.msk.msra.mxu0 %vm1434_vm10, %v2141_v31  ;;  %vm1429_vm13 = vcmp.gt.f32.partialorder %v1351_v46, %v2555_v21  ;;  %vm1428_vm10 = vcmp.gt.f32.partialorder %v1351_v46, %v2550_v27 }
 0x516   : > { %2040 = vmatpush1.msk.msra.mxu1 %vm1218_vm11, %v2141_v31  ;;  %vm1529_vm15 = vmand %vm1465_vm1, %vm1497_vm9  ;;  %vm1430_vm1 = vcmp.gt.f32.partialorder %v1356_v1, %v2550_v27  ;;  %vm3785_vm11 = vcmp.gt.f32.partialorder %v2503_v41, 0.5 }
 0x517   : > { %vm1561_vm14 = vmor %vm1433_vm0, %vm1529_vm15  ;;  %1788 = vmatmul.mubr.f32.vlgmr.msra.gmra.mxu1 %v2141_v31  ;;  %vm3786_vm15 = vcmp.gt.f32.partialorder %v2505_v34, 0.5 }
 0x518   : > { %2003 = vmatprep.subr.msk.mxu0 %vm1561_vm14, %v2141_v31  ;;  %vm1527_vm12 = vmand %vm1463_vm5, %vm1495_vm4  ;;  %v754_v7 = vpop.xlane.xlu0 %753 }
 0x519   : > { %2004 = vmatpush1.msk.msra.mxu0 %vm1432_vm3, %v2141_v31  ;;  %vm1559_vm7 = vmor %vm1431_vm8, %vm1527_vm12  ;;  %v755_v49 = vrot.slane %v754_v7, 4  ;;  %vm1819_vm3 = vcmask 15360   ;;  %vm3789_vm12 = vcmask 7168  }
 0x51a   : > { %2005 = vmatprep.subr.msk.mxu0 %vm1559_vm7, %v2141_v31  ;;  %vm1525_vm9 = vmand %vm1461_vm6, %vm1493_vm2  ;;  %vm3787_vm6 = vcmask 1040384  }
 0x51b   : > { %2006 = vmatpush1.msk.msra.mxu0 %vm1430_vm1, %v2141_v31  ;;  %vm1557_vm0 = vmor %vm1429_vm13, %vm1525_vm9  ;;  %v756_v21 = vadd.f32 %v755_v49, %v754_v7  ;;  %vm1821_vm13 = vcmask 16384  }
 0x51c   : > { %2007 = vmatprep.subr.msk.mxu0 %vm1557_vm0, %v2141_v31  ;;  %vm3788_vm2 = vmmov %vm3787_vm6 }
 0x51d   : > { %2008 = vmatpush1.msk.msra.mxu0 %vm1428_vm10, %v2141_v31  ;;  %v757_v25 = vrot.slane %v756_v21, 2 }
 0x51e   : > { %1717 = vmatmul.mubr.f32.vlgmr.msra.gmra.mxu0 %v2141_v31 }
 0x51f   : > { %v758_v51 = vadd.f32 %v757_v25, %v756_v21 }
 0x521   : > { %v759_v14 = vrot.slane %v758_v51, 1 }
 0x523   : > { %v760_v15 = vadd.f32 %v759_v14, %v758_v51 }
 0x52d   : > { %v584_v60 = vpop.xlane.xlu1 %583 }
 0x52e   : > { %v585_v20 = vrot.slane %v584_v60, 4 }
 0x530   : > { %v586_v18 = vadd.f32 %v585_v20, %v584_v60 }
 0x532   : > { %v587_v17 = vrot.slane %v586_v18, 2 }
 0x534   : > { %v588_v22 = vadd.f32 %v587_v17, %v586_v18 }
 0x536   : > { %v589_v56 = vrot.slane %v588_v22, 1 }
 0x538   : > { %v590_v57 = vadd.f32 %v589_v56, %v588_v22 }
 0x53a   : > { %2045 = vpush %v590_v57 }
 0x53b   : > { %2047 = vpush %v760_v15 }
 0x56b   : > { %s3560_s13 = spop %2045 }
 0x56c   : > { %s1794_s14 = smul.f32 3.0, %s3560_s13  ;;  %s2048_s19 = spop %2047  ;;  %v1817_v6 = vstv %s3560_s13 }
 0x56d   : > { %v1815_v34 = vstv %s2048_s19 }
 0x56e   : > { %s1795_s18 = smin.f32 %s2142_s17, %s1794_s14 }
 0x56f   : > { %v1796_v58 = vstv %s1795_s18 }
 0x5d7   : > { %v1789_v27 = vpop.f32.mrf.mxu1 }
 0x5d9   : > { %v1791_v37 = vpop.f32.mrf.mxu1 }
 0x5de   : > { %v1718_v31 = vpop.f32.mrf.mxu0 }
 0x5df   : > { %v1790_v23 = vadd.f32 %v1789_v27, %v1718_v31 }
 0x5e0   : > { %v1720_v44 = vpop.f32.mrf.mxu0 }
 0x5e1   : > { %vm1797_vm5 = vcmp.lt.f32.partialorder %v1790_v23, %v1796_v58  ;;  %v1792_v0 = vadd.f32 %v1791_v37, %v1720_v44 }
 0x5e2   : > { %vm1799_vm4 = vmor %vm3785_vm11, %vm1797_vm5 }
 0x5e3   : > { %vm1798_vm8 = vcmp.lt.f32.partialorder %v1792_v0, %v1796_v58  ;;  %v1801_v32 = vsel %vm1799_vm4, %v2541_v43, 0.0 }
 0x5e4   : > { %vm1800_vm14 = vmor %vm3786_vm15, %vm1798_vm8  ;;  %v1803_v4 = vsel %vm3787_vm6, %v1801_v32, 0.0 }
 0x5e5   : > { %v1802_v30 = vsel %vm1800_vm14, %v2543_v19, 0.0 }
 0x5e6   : > { %v1804_v3 = vsel %vm3788_vm2, %v1802_v30, 0.0 }
 0x5e7   : > { %v1805_v29 = vadd.f32 %v1804_v3, %v1803_v4 }
 0x5e9   : > { %1806 = vadd.xlane.f32.xlu0 %v1805_v29 }
 0x672   : > { %v1807_v61 = vpop.xlane.xlu0 %1806 }
 0x673   : > { %v1808_v45 = vrot.slane %v1807_v61, 4 }
 0x675   : > { %v1809_v41 = vadd.f32 %v1808_v45, %v1807_v61 }
 0x677   : > { %v1810_v8 = vrot.slane %v1809_v41, 2 }
 0x679   : > { %v1811_v40 = vadd.f32 %v1810_v8, %v1809_v41 }
 0x67b   : > { %v1812_v16 = vrot.slane %v1811_v40, 1 }
 0x67d   : > { %v1813_v43 = vadd.f32 %v1812_v16, %v1811_v40 }
 0x67f   : > { %2053 = vpush %v1813_v43 }
 0x6b0   : > { %s2054_s20 = spop %2053 }
 0x6b1   : > { %v1816_v19 = vstv %s2054_s20 }
 0x6b2   : > { %v1818_v47 = vsel %vm3789_vm12, %v1815_v34, %v1816_v19 }
 0x6b3   : > { %v1820_v42 = vsel %vm1819_vm3, %v1818_v47, %v1817_v6 }
 0x6b4   : > { %1822 = vst.msk [vmem:[%s230_s23] sm:$0x1] %vm1821_vm13, %v1820_v42 }
 0x6b5 PF: > { %s14_s15 = sadd.s32 1, %s2131_s15  }
 0x6b6   : > { %p11_p4 = scmp.ge.s32.totalorder %s14_s15, 4  }
 0x6b8   :  { %13 = sbr.rel (!%p11_p4) target bundleno = 1 (0x1), region = 76 }

</bundles_post_ra>
